<compile_context>
chip_gen: v7x
topology: tpu7x:2x2x1
jax: 0.10.0
libtpu: 0.0.40
codegen_flags: <defaults>
</compile_context>

<pallas_src>
import jax
import jax.numpy as jnp
from jax.experimental import pallas as pl
from jax.experimental.pallas import tpu as pltpu

VOCAB_SIZE = 256
EMBEDDING_DIM = 32
CONTEXT_SIZE = 2
LATENT_SPACE_SIZE = 128

B_TILE = 128  # rows (contexts) per grid step; multiple of 8, lane/MXU friendly


def ngram_kernel(idx_ref, emb_ref, w1_ref, b1_ref, w2_ref, b2_ref, out_ref):
    b = idx_ref.shape[0]                                   # B_TILE (static)
    idx = idx_ref[...]                                     # (B, CONTEXT_SIZE) int32

    # Lane iota over the vocab, reused for every context position.
    vocab_iota = jax.lax.broadcasted_iota(jnp.int32, (b, VOCAB_SIZE), 1)

    # Hidden layer: h = sum_c emb_table[idx[:, c]] @ w1[c]   (f32 accumulation)
    h = jnp.zeros((b, LATENT_SPACE_SIZE), jnp.float32)
    for c in range(CONTEXT_SIZE):
        # Exact row gather via one-hot matmul (stays on the MXU, no XLU shuffles).
        onehot = (vocab_iota == idx[:, c:c + 1]).astype(jnp.bfloat16)   # (B, VOCAB)
        emb_c = jnp.dot(onehot, emb_ref[...],
                        preferred_element_type=jnp.float32)             # (B, EMB) f32
        h = h + jnp.dot(emb_c.astype(jnp.bfloat16), w1_ref[c],
                        preferred_element_type=jnp.float32)             # (B, LATENT)

    # Bias + ReLU in f32.
    h = jnp.maximum(h + b1_ref[...], 0.0)

    # Second linear (bf16 MXU, f32 accumulate) + bias in f32.
    logits = jnp.dot(h.astype(jnp.bfloat16), w2_ref[...],
                     preferred_element_type=jnp.float32) + b2_ref[...]  # (B, VOCAB)

    # log_softmax along dim=1 (f32).
    m = jnp.max(logits, axis=1, keepdims=True)
    shifted = logits - m
    lse = jnp.log(jnp.sum(jnp.exp(shifted), axis=1, keepdims=True))
    out_ref[...] = shifted - lse


def ngram_forward(indices, emb_bf16, w1_bf16, b1, w2_bf16, b2, *, b_tile=B_TILE):
    """indices: int32 (B, CONTEXT_SIZE); returns (B, VOCAB_SIZE) f32 log-probs.

    Each output row equals the PyTorch module's forward() for that context.
    """
    B = indices.shape[0]
    assert B % b_tile == 0, "batch must be a multiple of the batch tile"

    grid_spec = pltpu.PrefetchScalarGridSpec(
        num_scalar_prefetch=0,
        grid=(B // b_tile,),
        in_specs=[
            pl.BlockSpec((b_tile, CONTEXT_SIZE), lambda i: (i, 0)),
            pl.BlockSpec((VOCAB_SIZE, EMBEDDING_DIM), lambda i: (0, 0)),
            pl.BlockSpec((CONTEXT_SIZE, EMBEDDING_DIM, LATENT_SPACE_SIZE),
                         lambda i: (0, 0, 0)),
            pl.BlockSpec((1, LATENT_SPACE_SIZE), lambda i: (0, 0)),
            pl.BlockSpec((LATENT_SPACE_SIZE, VOCAB_SIZE), lambda i: (0, 0)),
            pl.BlockSpec((1, VOCAB_SIZE), lambda i: (0, 0)),
        ],
        out_specs=pl.BlockSpec((b_tile, VOCAB_SIZE), lambda i: (i, 0)),
    )
    return pl.pallas_call(
        ngram_kernel,
        out_shape=jax.ShapeDtypeStruct((B, VOCAB_SIZE), jnp.float32),
        grid_spec=grid_spec,
        compiler_params=pltpu.CompilerParams(
            dimension_semantics=("parallel",),   # batch axis -> 2 TCs on v7x
        ),
    )(indices, emb_bf16, w1_bf16, b1, w2_bf16, b2)


def ngram_reference(indices, emb_bf16, w1_bf16, b1, w2_bf16, b2):
    """Pure-JAX reference mirroring the kernel's bf16 quantization points."""
    emb = emb_bf16.astype(jnp.float32)
    embeds = emb[indices].reshape(indices.shape[0], -1)          # (B, ctx*emb)
    w1 = w1_bf16.reshape(CONTEXT_SIZE * EMBEDDING_DIM,
                         LATENT_SPACE_SIZE).astype(jnp.float32)
    h = jnp.maximum(embeds @ w1 + b1, 0.0)
    h = h.astype(jnp.bfloat16).astype(jnp.float32)               # mirror kernel cast
    logits = h @ w2_bf16.astype(jnp.float32) + b2
    return jax.nn.log_softmax(logits, axis=1)


if __name__ == "__main__":
    key = jax.random.PRNGKey(0)
    k_emb, k_w1, k_b1, k_w2, k_b2, k_idx = jax.random.split(key, 6)

    in_dim = CONTEXT_SIZE * EMBEDDING_DIM

    # Deterministic parameter init (PyTorch-like scales), then cast to bf16
    # for the MXU-facing weights; biases stay f32.
    emb_table = jax.random.normal(k_emb, (VOCAB_SIZE, EMBEDDING_DIM), jnp.float32)
    lim1 = 1.0 / jnp.sqrt(in_dim)
    w1_t = jax.random.uniform(k_w1, (in_dim, LATENT_SPACE_SIZE), jnp.float32, -lim1, lim1)
    b1 = jax.random.uniform(k_b1, (1, LATENT_SPACE_SIZE), jnp.float32, -lim1, lim1)
    lim2 = 1.0 / jnp.sqrt(LATENT_SPACE_SIZE)
    w2_t = jax.random.uniform(k_w2, (LATENT_SPACE_SIZE, VOCAB_SIZE), jnp.float32, -lim2, lim2)
    b2 = jax.random.uniform(k_b2, (1, VOCAB_SIZE), jnp.float32, -lim2, lim2)

    emb_bf16 = emb_table.astype(jnp.bfloat16)
    # Split linear1's weight per context position: (ctx*emb, latent) -> (ctx, emb, latent).
    w1_bf16 = w1_t.reshape(CONTEXT_SIZE, EMBEDDING_DIM, LATENT_SPACE_SIZE).astype(jnp.bfloat16)
    w2_bf16 = w2_t.astype(jnp.bfloat16)

    # A small batch of contexts (2 grid steps of B_TILE rows each); each row is
    # one invocation of the original module's forward().
    B = 2 * B_TILE
    indices = jax.random.randint(k_idx, (B, CONTEXT_SIZE), 0, VOCAB_SIZE, jnp.int32)

    log_probs = ngram_forward(indices, emb_bf16, w1_bf16, b1, w2_bf16, b2)
    log_probs = jax.block_until_ready(log_probs)

    ref = ngram_reference(indices, emb_bf16, w1_bf16, b1, w2_bf16, b2)
    assert log_probs.shape == (B, VOCAB_SIZE)
    assert jnp.allclose(log_probs, ref, atol=2e-3, rtol=2e-3)

    print("KERNEL_OK")
</pallas_src>

<mosaic_0001>
module attributes {stable_mosaic.version = 11 : i64} {
  func.func @ngram_kernel(%arg0: i32, %arg1: memref<128x2xi32, #tpu.memory_space<vmem>>, %arg2: memref<256x32xbf16, #tpu.memory_space<vmem>>, %arg3: memref<2x32x128xbf16, #tpu.memory_space<vmem>>, %arg4: memref<1x128xf32, #tpu.memory_space<vmem>>, %arg5: memref<128x256xbf16, #tpu.memory_space<vmem>>, %arg6: memref<1x256xf32, #tpu.memory_space<vmem>>, %arg7: memref<128x256xf32, #tpu.memory_space<vmem>>) attributes {dimension_semantics = [#tpu.dimension_semantics<parallel>], iteration_bounds = array<i64: 2>, scalar_prefetch = 0 : i64, scratch_operands = 0 : i64, tpu.core_type = #tpu.core_type<tc>, window_params = [{transform_indices = @transform_0, window_bounds = array<i64: 128, 2>}, {pipeline_mode = #tpu.pipeline_mode<synchronous>, transform_indices = @transform_1, window_bounds = array<i64: 256, 32>}, {pipeline_mode = #tpu.pipeline_mode<synchronous>, transform_indices = @transform_2, window_bounds = array<i64: 2, 32, 128>}, {pipeline_mode = #tpu.pipeline_mode<synchronous>, transform_indices = @transform_3, window_bounds = array<i64: 1, 128>}, {pipeline_mode = #tpu.pipeline_mode<synchronous>, transform_indices = @transform_4, window_bounds = array<i64: 128, 256>}, {pipeline_mode = #tpu.pipeline_mode<synchronous>, transform_indices = @transform_5, window_bounds = array<i64: 1, 256>}, {transform_indices = @transform_6, window_bounds = array<i64: 128, 256>}]} {
    %c0 = arith.constant 0 : index
    %c0_0 = arith.constant 0 : index
    %0 = vector.load %arg1[%c0, %c0_0] : memref<128x2xi32, #tpu.memory_space<vmem>>, vector<128x2xi32>
    %1 = tpu.iota {dimensions = array<i32: 1>} : vector<128x256xi32>
    %cst = arith.constant 0.000000e+00 : f32
    %2 = vector.broadcast %cst : f32 to vector<128x128xf32>
    %3 = vector.extract_strided_slice %0 {offsets = [0, 0], sizes = [128, 1], strides = [1, 1]} : vector<128x2xi32> to vector<128x1xi32>
    %4 = vector.broadcast %3 : vector<128x1xi32> to vector<128x256xi32>
    %5 = arith.cmpi eq, %1, %4 : vector<128x256xi32>
    %6 = arith.extui %5 : vector<128x256xi1> to vector<128x256xi32>
    %7 = arith.sitofp %6 : vector<128x256xi32> to vector<128x256xf32>
    %8 = arith.truncf %7 : vector<128x256xf32> to vector<128x256xbf16>
    %c0_1 = arith.constant 0 : index
    %c0_2 = arith.constant 0 : index
    %9 = vector.load %arg2[%c0_1, %c0_2] : memref<256x32xbf16, #tpu.memory_space<vmem>>, vector<256x32xbf16>
    %cst_3 = arith.constant dense<0.000000e+00> : vector<128x32xf32>
    %10 = tpu.matmul %8, %9, %cst_3 {dimension_numbers = #tpu.dot_dimension_numbers<[1], [0], [0], [1], [0, 0, 1, 1], [], []>} : vector<128x256xbf16>, vector<256x32xbf16>, vector<128x32xf32> -> vector<128x32xf32>
    %11 = arith.truncf %10 : vector<128x32xf32> to vector<128x32xbf16>
    %c0_4 = arith.constant 0 : index
    %c0_5 = arith.constant 0 : index
    %c0_6 = arith.constant 0 : index
    %12 = vector.load %arg3[%c0_4, %c0_5, %c0_6] : memref<2x32x128xbf16, #tpu.memory_space<vmem>>, vector<1x32x128xbf16>
    %13 = vector.shape_cast %12 : vector<1x32x128xbf16> to vector<32x128xbf16>
    %cst_7 = arith.constant dense<0.000000e+00> : vector<128x128xf32>
    %14 = tpu.matmul %11, %13, %cst_7 {dimension_numbers = #tpu.dot_dimension_numbers<[1], [0], [0], [1], [0, 0, 1, 1], [], []>} : vector<128x32xbf16>, vector<32x128xbf16>, vector<128x128xf32> -> vector<128x128xf32>
    %15 = arith.addf %2, %14 : vector<128x128xf32>
    %16 = vector.extract_strided_slice %0 {offsets = [0, 1], sizes = [128, 1], strides = [1, 1]} : vector<128x2xi32> to vector<128x1xi32>
    %17 = vector.broadcast %16 : vector<128x1xi32> to vector<128x256xi32>
    %18 = arith.cmpi eq, %1, %17 : vector<128x256xi32>
    %19 = arith.extui %18 : vector<128x256xi1> to vector<128x256xi32>
    %20 = arith.sitofp %19 : vector<128x256xi32> to vector<128x256xf32>
    %21 = arith.truncf %20 : vector<128x256xf32> to vector<128x256xbf16>
    %c0_8 = arith.constant 0 : index
    %c0_9 = arith.constant 0 : index
    %22 = vector.load %arg2[%c0_8, %c0_9] : memref<256x32xbf16, #tpu.memory_space<vmem>>, vector<256x32xbf16>
    %cst_10 = arith.constant dense<0.000000e+00> : vector<128x32xf32>
    %23 = tpu.matmul %21, %22, %cst_10 {dimension_numbers = #tpu.dot_dimension_numbers<[1], [0], [0], [1], [0, 0, 1, 1], [], []>} : vector<128x256xbf16>, vector<256x32xbf16>, vector<128x32xf32> -> vector<128x32xf32>
    %24 = arith.truncf %23 : vector<128x32xf32> to vector<128x32xbf16>
    %c1 = arith.constant 1 : index
    %c0_11 = arith.constant 0 : index
    %c0_12 = arith.constant 0 : index
    %25 = vector.load %arg3[%c1, %c0_11, %c0_12] : memref<2x32x128xbf16, #tpu.memory_space<vmem>>, vector<1x32x128xbf16>
    %26 = vector.shape_cast %25 : vector<1x32x128xbf16> to vector<32x128xbf16>
    %cst_13 = arith.constant dense<0.000000e+00> : vector<128x128xf32>
    %27 = tpu.matmul %24, %26, %cst_13 {dimension_numbers = #tpu.dot_dimension_numbers<[1], [0], [0], [1], [0, 0, 1, 1], [], []>} : vector<128x32xbf16>, vector<32x128xbf16>, vector<128x128xf32> -> vector<128x128xf32>
    %28 = arith.addf %15, %27 : vector<128x128xf32>
    %c0_14 = arith.constant 0 : index
    %c0_15 = arith.constant 0 : index
    %29 = vector.load %arg4[%c0_14, %c0_15] : memref<1x128xf32, #tpu.memory_space<vmem>>, vector<1x128xf32>
    %30 = vector.broadcast %29 : vector<1x128xf32> to vector<128x128xf32>
    %31 = arith.addf %28, %30 : vector<128x128xf32>
    %cst_16 = arith.constant 0.000000e+00 : f32
    %32 = vector.broadcast %cst_16 : f32 to vector<128x128xf32>
    %33 = arith.maximumf %31, %32 : vector<128x128xf32>
    %34 = arith.truncf %33 : vector<128x128xf32> to vector<128x128xbf16>
    %c0_17 = arith.constant 0 : index
    %c0_18 = arith.constant 0 : index
    %35 = vector.load %arg5[%c0_17, %c0_18] : memref<128x256xbf16, #tpu.memory_space<vmem>>, vector<128x256xbf16>
    %cst_19 = arith.constant dense<0.000000e+00> : vector<128x256xf32>
    %36 = tpu.matmul %34, %35, %cst_19 {dimension_numbers = #tpu.dot_dimension_numbers<[1], [0], [0], [1], [0, 0, 1, 1], [], []>} : vector<128x128xbf16>, vector<128x256xbf16>, vector<128x256xf32> -> vector<128x256xf32>
    %c0_20 = arith.constant 0 : index
    %c0_21 = arith.constant 0 : index
    %37 = vector.load %arg6[%c0_20, %c0_21] : memref<1x256xf32, #tpu.memory_space<vmem>>, vector<1x256xf32>
    %38 = vector.broadcast %37 : vector<1x256xf32> to vector<128x256xf32>
    %39 = arith.addf %36, %38 : vector<128x256xf32>
    %cst_22 = arith.constant dense<0xFF800000> : vector<128xf32>
    %40 = vector.multi_reduction <maximumf>, %39, %cst_22 [1] : vector<128x256xf32> to vector<128xf32>
    %41 = vector.shape_cast %40 : vector<128xf32> to vector<128x1xf32>
    %42 = vector.broadcast %41 : vector<128x1xf32> to vector<128x256xf32>
    %43 = arith.subf %39, %42 : vector<128x256xf32>
    %44 = math.exp %43 : vector<128x256xf32>
    %cst_23 = arith.constant dense<0.000000e+00> : vector<128xf32>
    %45 = vector.multi_reduction <add>, %44, %cst_23 [1] : vector<128x256xf32> to vector<128xf32>
    %46 = vector.shape_cast %45 : vector<128xf32> to vector<128x1xf32>
    %47 = math.log %46 : vector<128x1xf32>
    %48 = vector.broadcast %47 : vector<128x1xf32> to vector<128x256xf32>
    %49 = arith.subf %43, %48 : vector<128x256xf32>
    %c0_24 = arith.constant 0 : index
    %c0_25 = arith.constant 0 : index
    %50 = vector.load %arg7[%c0_24, %c0_25] : memref<128x256xf32, #tpu.memory_space<vmem>>, vector<128x256xf32>
    tpu.vector_store %arg7[%c0_24, %c0_25], %49 {strides = array<i32>} : memref<128x256xf32, #tpu.memory_space<vmem>>, vector<128x256xf32>,
    return
  }
  func.func @transform_0(%arg0: i32) -> (i32, i32) {
    %c0_i32 = arith.constant 0 : i32
    %c0_i32_0 = arith.constant 0 : i32
    return %arg0, %c0_i32 : i32, i32
  }
  func.func @transform_1(%arg0: i32) -> (i32, i32) {
    %c0_i32 = arith.constant 0 : i32
    %c0_i32_0 = arith.constant 0 : i32
    %c0_i32_1 = arith.constant 0 : i32
    return %c0_i32, %c0_i32_0 : i32, i32
  }
  func.func @transform_2(%arg0: i32) -> (i32, i32, i32) {
    %c0_i32 = arith.constant 0 : i32
    %c0_i32_0 = arith.constant 0 : i32
    %c0_i32_1 = arith.constant 0 : i32
    %c0_i32_2 = arith.constant 0 : i32
    return %c0_i32, %c0_i32_0, %c0_i32_1 : i32, i32, i32
  }
  func.func @transform_3(%arg0: i32) -> (i32, i32) {
    %c0_i32 = arith.constant 0 : i32
    %c0_i32_0 = arith.constant 0 : i32
    %c0_i32_1 = arith.constant 0 : i32
    return %c0_i32, %c0_i32_0 : i32, i32
  }
  func.func @transform_4(%arg0: i32) -> (i32, i32) {
    %c0_i32 = arith.constant 0 : i32
    %c0_i32_0 = arith.constant 0 : i32
    %c0_i32_1 = arith.constant 0 : i32
    return %c0_i32, %c0_i32_0 : i32, i32
  }
  func.func @transform_5(%arg0: i32) -> (i32, i32) {
    %c0_i32 = arith.constant 0 : i32
    %c0_i32_0 = arith.constant 0 : i32
    %c0_i32_1 = arith.constant 0 : i32
    return %c0_i32, %c0_i32_0 : i32, i32
  }
  func.func @transform_6(%arg0: i32) -> (i32, i32) {
    %c0_i32 = arith.constant 0 : i32
    %c0_i32_0 = arith.constant 0 : i32
    return %arg0, %c0_i32 : i32, i32
  }
}

</mosaic_0001>

<bundles_post_ra>
// kernel: tpu_custom_call.1
= control target key start
LH: loop header
LB: loop body
LE: loop exit
PB: predicated region body
PF: predicated region fallthrough
CT: control target
= control target key end

     0   :  { %11 = vsyncpa [#allocation3], 0  ;;  %s3289_s0 = inlined_call_operand.vmem [shape: s32[256,2], index: 0, kind: input, shape index: {}]   ;;  %s3290_s1 = inlined_call_operand.vmem [shape: bf16[256,32], index: 1, kind: input, shape index: {}]   ;;  %s3291_s2 = inlined_call_operand.vmem [shape: bf16[2,32,128], index: 2, kind: input, shape index: {}]   ;;  %s3292_s3 = inlined_call_operand.vmem [shape: f32[1,128], index: 3, kind: input, shape index: {}]   ;;  %s3293_s4 = inlined_call_operand.vmem [shape: bf16[128,256], index: 4, kind: input, shape index: {}]   ;;  %s3294_s5 = inlined_call_operand.vmem [shape: f32[1,256], index: 5, kind: input, shape index: {}]   ;;  %s3295_s6 = inlined_call_operand.hbm [shape: f32[256,256], index: 6, kind: output, shape index: {}]  }
   0x1   :  { %13 = vsyncpa [#allocation3 + $0x1], 0  ;;  %s2542_s21 = smov 0   ;;  %s2544_s22 = smov 0  }
   0x2   :  { %s2546_s23 = smov 0   ;;  %s2548_s24 = smov 0  }
   0x3 LB: > { %s2563_s25 = sadd.s32 4294967295, %s2499_s24   ;;  %s1840_s26 = sadd.s32 4294967294, %s2499_s24   ;;  %s2499_s24 = sphi %s2548_s24, %s3301_s24   ;;  %s2495_s23 = sphi %s2546_s23, %s3300_s23   ;;  %s2491_s22 = sphi %s2544_s22, %s3299_s22   ;;  %s2487_s21 = sphi %s2542_s21, %s3298_s21  }
   0x4   : > { %s2567_s27 = sadd.s32 1, %s2499_s24   ;;  %s157_s28 = sadd.s32 1, %s2495_s23 }
   0x5   : > { %s154_s29 = ssub.s32 %s2499_s24, %s2567_s27  ;;  %p167_p0 = scmp.ne.s32.totalorder %s2495_s23, %s2491_s22 }
   0x6   : > { %p155_p1 = scmp.eq.s32.totalorder %s154_s29, 0  ;;  %p168_p2 = scmp.eq.s32.totalorder %s2563_s25, 1 }
   0x7   : > { %p173_p3 = scmp.ne.s32.totalorder %s2491_s22, %s2487_s21  ;;  %p174_p4 = scmp.eq.s32.totalorder %s1840_s26, 1 }
   0x8   : > { %s2578_s30 = scalar_select %p155_p1, %s2495_s23, %s157_s28  }
   0x9   : > { %p2580_p5 = por %p168_p2, %p167_p0  ;;  %p2584_p6 = por %p174_p4, %p173_p3 }
   0xa   : > { %p1843_p7 = scmp.ge.s32.totalorder %s2499_s24, 1  ;;  %p216_p8 = scmp.lt.s32.totalorder %s2499_s24, 3 }
   0xc   : > { %p217_p9 = pnand %p1843_p7, %p216_p8 }
   0xd   : > { %s1845_s9 = sshll.u32 (!%p217_p9), %s2563_s25, 4  ;;  %v2297_v0 = vld [vmem:[%s3290_s1 + $0x40] sm:$0xff] (!%p217_p9)   ;;  %v2501_v1 = vmov (!%p217_p9), 1   ;;  %v2299_v3 = vld [vmem:[%s3290_s1 + $0x48] sm:$0xff] (!%p217_p9)   ;;  %v2301_v5 = vld [vmem:[%s3290_s1 + $0x50] sm:$0xff] (!%p217_p9)   ;;  %v2502_v31 = vmov (!%p217_p9), 0   ;;  %v270_v35 = vlaneseq (!%p217_p9) }
   0xe   : > { %220 = sbr.rel (%p217_p9) target bundleno = 1273 (0x4f9), region = 44  ;;  %2289 = vset.pattern.permute.xlu1 (!%p217_p9), %v2501_v1  ;;  %2288 = vset.pattern.permute.xlu0 (!%p217_p9), %v2501_v1  ;;  %p247_p10 = scmp.lt.s32.totalorder (!%p217_p9), %s1845_s9, 31  ;;  %v2298_v2 = vld [vmem:[%s3290_s1] sm:$0xff] (!%p217_p9)   ;;  %v2300_v4 = vld [vmem:[%s3290_s1 + $0x8] sm:$0xff] (!%p217_p9)   ;;  %v2302_v8 = vld [vmem:[%s3290_s1 + $0x10] sm:$0xff] (!%p217_p9)  }
   0xf   : > { %2104 = vmatprep.subr.bf16.mxu1 (!%p217_p9), %v2297_v0  ;;  %2040 = vmatprep.subr.bf16.mxu0 (!%p217_p9), %v2297_v0  ;;  %v2303_v13 = vld [vmem:[%s3290_s1 + $0x58] sm:$0xff] (!%p217_p9)   ;;  %v2305_v15 = vld [vmem:[%s3290_s1 + $0x60] sm:$0xff] (!%p217_p9)   ;;  %v2307_v19 = vld [vmem:[%s3290_s1 + $0x68] sm:$0xff] (!%p217_p9)   ;;  %v2692_v36 = vand.u32 (!%p217_p9), 127, %v270_v35  ;;  %v2503_v44 = vmov (!%p217_p9), 1.0|1.0  }
  0x10   : > { %2105 = vmatpush3.bf16.msra.mxu1 (!%p217_p9), %v2298_v2  ;;  %2041 = vmatpush3.bf16.msra.mxu0 (!%p217_p9), %v2298_v2  ;;  %v2304_v14 = vld [vmem:[%s3290_s1 + $0x18] sm:$0xff] (!%p217_p9)   ;;  %v2306_v17 = vld [vmem:[%s3290_s1 + $0x20] sm:$0xff] (!%p217_p9)   ;;  %v2308_v22 = vld [vmem:[%s3290_s1 + $0x28] sm:$0xff] (!%p217_p9)   ;;  %s243_s16 = sand.u32 (!%p217_p9), 1, %s2491_s22   ;;  %s2504_s10 = smov (!%p217_p9), [#allocation2]  }
  0x11   : > { %2106 = vmatprep.subr.bf16.mxu1 (!%p217_p9), %v2299_v3  ;;  %2042 = vmatprep.subr.bf16.mxu0 (!%p217_p9), %v2299_v3  ;;  %v2309_v23 = vld [vmem:[%s3290_s1 + $0x70] sm:$0xff] (!%p217_p9)   ;;  %v2311_v27 = vld [vmem:[%s3290_s1 + $0x78] sm:$0xff] (!%p217_p9)   ;;  %v2695_v39 = vadd.s32 (!%p217_p9), 128, %v2692_v36  ;;  %s2441_s11 = sshll.u32 (!%p217_p9), %s2504_s10, 4  ;;  %s2442_s11 = int_to_ptr.vmem [resolvable:$false] %s2441_s11 }
  0x12   : > { %v2310_v24 = vld [vmem:[%s3290_s1 + $0x30] sm:$0xff] (!%p217_p9)   ;;  %v2312_v28 = vld [vmem:[%s3290_s1 + $0x38] sm:$0xff] (!%p217_p9)   ;;  %s2443_s12 = scalar_lea.vmem (!%p217_p9), %s2442_s11, 8192 }
  0x13   : > { %v2688_v34 = vld [vmem:[%s3291_s2 + $0x10] sm:$0xff] (!%p217_p9)  }
  0x14   : > { %2107 = vmatpush3.bf16.msra.mxu1 (!%p217_p9), %v2300_v4  ;;  %2043 = vmatpush3.bf16.msra.mxu0 (!%p217_p9), %v2300_v4 }
  0x15   : > { %s3303_s9 = smov (!%p247_p10, %s1845_s9), 31  ;;  %2108 = vmatprep.subr.bf16.mxu1 %v2301_v5  ;;  %2044 = vmatprep.subr.bf16.mxu0 %v2301_v5 }
  0x16   : > { %s1846_s18 = sshll.u32 %s3303_s9, 3 }
  0x17   : > { %s2611_s29 = scalar_lea.vmem %s3289_s0, %s1846_s18  ;;  %s2039_s18 = sshll.u32 %s2563_s25, 12 }
  0x18   : > { %v2614_v6 = vld [vmem:[%s2611_s29 + $0x10] sm:$0xff]  ;;  %v2617_v7 = vld [vmem:[%s2611_s29] sm:$0xff]  ;;  %v2625_v9 = vld [vmem:[%s2611_s29 + $0x18] sm:$0xff]  ;;  %2109 = vmatpush3.bf16.msra.mxu1 %v2302_v8  ;;  %2045 = vmatpush3.bf16.msra.mxu0 %v2302_v8  ;;  %s3236_s28 = scalar_lea.hbm %s3295_s6, %s2039_s18  ;;  %s3248_s25 = scalar_lea.sflag [#allocation3], %s243_s16 }
  0x19   : > { %677 = vperm.xlu1 %2289, %v2614_v6   ;;  %671 = vperm.xlu0 %2288, %v2617_v7   ;;  %v255_v10 = vld [vmem:[%s2611_s29 + $0x8] sm:$0xff]  ;;  %v258_v12 = vld [vmem:[%s2611_s29 + $0x20] sm:$0xff]  ;;  %v261_v16 = vld [vmem:[%s2611_s29 + $0x38] sm:$0xff] }
  0x1a   : > { %v2629_v11 = vld [vmem:[%s2611_s29 + $0x28] sm:$0xff]  ;;  %2110 = vmatprep.subr.bf16.mxu1 %v2303_v13  ;;  %2046 = vmatprep.subr.bf16.mxu0 %v2303_v13  ;;  %v260_v18 = vld [vmem:[%s2611_s29 + $0x30] sm:$0xff]  ;;  %v262_v21 = vld [vmem:[%s2611_s29 + $0x40] sm:$0xff] }
  0x1b   : > { %v263_v20 = vld [vmem:[%s2611_s29 + $0x48] sm:$0xff]  ;;  %v265_v25 = vld [vmem:[%s2611_s29 + $0x58] sm:$0xff]  ;;  %v264_v26 = vld [vmem:[%s2611_s29 + $0x50] sm:$0xff] }
  0x1c   : > { %2111 = vmatpush3.bf16.msra.mxu1 %v2304_v14  ;;  %2047 = vmatpush3.bf16.msra.mxu0 %v2304_v14  ;;  %v267_v29 = vld [vmem:[%s2611_s29 + $0x68] sm:$0xff]  ;;  %v266_v30 = vld [vmem:[%s2611_s29 + $0x60] sm:$0xff]  ;;  %v268_v32 = vld [vmem:[%s2611_s29 + $0x70] sm:$0xff] }
  0x1d   : > { %680 = vperm.xlu1 %2289, %v2625_v9   ;;  %674 = vperm.xlu0 %2288, %v255_v10   ;;  %v269_v33 = vld [vmem:[%s2611_s29 + $0x78] sm:$0xff]  ;;  %v2315_v8 = vld [vmem:[%s3291_s2] sm:$0xff]   ;;  %s1844_s29 = sshll.u32 %s243_s16, 8 }
  0x1e   : > { %2112 = vmatprep.subr.bf16.mxu1 %v2305_v15  ;;  %2048 = vmatprep.subr.bf16.mxu0 %v2305_v15  ;;  %v2325_v13 = vld [vmem:[%s3293_s4 + $0x24] ss:$8 sps:$4 sm:$0xff]   ;;  %v2323_v14 = vld [vmem:[%s3293_s4 + $0x20] ss:$8 sps:$4 sm:$0xff]   ;;  %v2328_v15 = vld [vmem:[%s3293_s4 + $0x34] ss:$8 sps:$4 sm:$0xff]  }
  0x1f   : > { %s3173_s17 = scalar_lea.vmem [#allocation2], %s1844_s29 }
  0x20   : > { %2113 = vmatpush3.bf16.msra.mxu1 %v2306_v17  ;;  %2049 = vmatpush3.bf16.msra.mxu0 %v2306_v17  ;;  %v2331_v17 = vld [vmem:[%s3293_s4 + $0x44] ss:$8 sps:$4 sm:$0xff]   ;;  %s1778_s19 = sshll.u32 %s3173_s17, 4  ;;  %s3238_s19 = int_to_ptr.vmem [resolvable:$true] %s1778_s19 }
  0x21   : > { %686 = vperm.xlu1 %2289, %v2629_v11   ;;  %683 = vperm.xlu0 %2288, %v258_v12   ;;  %s2437_s9 = scalar_lea.vmem %s3238_s19, 4096  ;;  %p2444_p0 = scmp.lt.s32.totalorder %s3238_s19, %s2442_s11 }
  0x22   : > { %2114 = vmatprep.subr.bf16.mxu1 %v2307_v19  ;;  %2050 = vmatprep.subr.bf16.mxu0 %v2307_v19  ;;  %v2334_v19 = vld [vmem:[%s3293_s4 + $0x54] ss:$8 sps:$4 sm:$0xff]   ;;  %p2438_p11 = scmp.ne.s32.totalorder %s3238_s19, %s2437_s9  ;;  %p2445_p1 = scmp.lt.s32.totalorder %s2443_s12, %s2437_s9 }
  0x24   : > { %2115 = vmatpush3.bf16.msra.mxu1 %v2308_v22  ;;  %2051 = vmatpush3.bf16.msra.mxu0 %v2308_v22  ;;  %v2335_v22 = vld [vmem:[%s3293_s4 + $0x60] ss:$8 sps:$4 sm:$0xff]   ;;  %p2439_p12 = pnand %p2438_p11, %p2580_p5  ;;  %p2446_p2 = por %p2445_p1, %p2444_p0 }
  0x25   : > { %692 = vperm.xlu1 %2289, %v261_v16   ;;  %689 = vperm.xlu0 %2288, %v260_v18  }
  0x26   : > { %2116 = vmatprep.subr.bf16.mxu1 %v2309_v23  ;;  %2052 = vmatprep.subr.bf16.mxu0 %v2309_v23  ;;  %p2440_p13 = pneg %p2439_p12 }
  0x28   : > { %2117 = vmatpush3.bf16.msra.mxu1 %v2310_v24  ;;  %2053 = vmatpush3.bf16.msra.mxu0 %v2310_v24  ;;  %p2447_p3 = pnand %p2446_p2, %p2440_p13 }
  0x29   : > { %698 = vperm.xlu1 %2289, %v263_v20   ;;  %695 = vperm.xlu0 %2288, %v262_v21  }
  0x2a   : > { %2118 = vmatprep.subr.bf16.mxu1 %v2311_v27  ;;  %2054 = vmatprep.subr.bf16.mxu0 %v2311_v27 }
  0x2c   : > { %2119 = vmatpush3.bf16.msra.mxu1 %v2312_v28  ;;  %2055 = vmatpush3.bf16.msra.mxu0 %v2312_v28 }
  0x2d   : > { %704 = vperm.xlu1 %2289, %v265_v25   ;;  %701 = vperm.xlu0 %2288, %v264_v26  }
  0x2e   : > { %2188 = vmatprep.subr.bf16.mxu0 %v2688_v34 }
  0x31   : > { %710 = vperm.xlu1 %2289, %v267_v29   ;;  %707 = vperm.xlu0 %2288, %v266_v30  }
  0x35   : > { %2291 = vset.pattern.permute.xlu1 %v2502_v31  ;;  %2290 = vset.pattern.permute.xlu0 %v2502_v31 }
  0x36   : > { %277 = vperm.xlu1 %2291, %v255_v10   ;;  %274 = vperm.xlu0 %2290, %v2617_v7   ;;  %v2314_v7 = vld [vmem:[%s3291_s2 + $0x18] sm:$0xff]   ;;  %v2319_v10 = vld [vmem:[%s3293_s4 + $0x4] ss:$8 sps:$4 sm:$0xff]  }
  0x37   : > { %1362 = vmatprep.subr.bf16.mxu1 %v2319_v10 }
  0x3a   : > { %2292 = vset.pattern.permute.xlu1 %v2501_v1  ;;  %2293 = vset.pattern.permute.xlu0 %v2501_v1 }
  0x3b   : > { %713 = vperm.xlu1 %2292, %v268_v32   ;;  %716 = vperm.xlu0 %2293, %v269_v33  }
  0x3f   : > { %2294 = vset.pattern.permute.xlu1 %v2502_v31  ;;  %2295 = vset.pattern.permute.xlu0 %v2502_v31 }
  0x40   : > { %280 = vperm.xlu1 %2294, %v2614_v6   ;;  %286 = vperm.xlu0 %2295, %v258_v12   ;;  %v2320_v12 = vld [vmem:[%s3293_s4 + $0x10] ss:$8 sps:$4 sm:$0xff]  }
  0x44   : > { %283 = vperm.xlu1 %2294, %v2625_v9   ;;  %295 = vperm.xlu0 %2295, %v261_v16   ;;  %v2317_v9 = vld [vmem:[%s3293_s4] ss:$8 sps:$4 sm:$0xff]   ;;  %v2326_v16 = vld [vmem:[%s3293_s4 + $0x30] ss:$8 sps:$4 sm:$0xff]  }
  0x48   : > { %289 = vperm.xlu1 %2294, %v2629_v11   ;;  %301 = vperm.xlu0 %2295, %v263_v20   ;;  %v2322_v11 = vld [vmem:[%s3293_s4 + $0x14] ss:$8 sps:$4 sm:$0xff]   ;;  %v2332_v20 = vld [vmem:[%s3293_s4 + $0x50] ss:$8 sps:$4 sm:$0xff]  }
  0x4c   : > { %292 = vperm.xlu1 %2294, %v260_v18   ;;  %307 = vperm.xlu0 %2295, %v265_v25   ;;  %v2329_v18 = vld [vmem:[%s3293_s4 + $0x40] ss:$8 sps:$4 sm:$0xff]  }
  0x50   : > { %298 = vperm.xlu1 %2294, %v262_v21   ;;  %313 = vperm.xlu0 %2295, %v267_v29   ;;  %v2337_v21 = vld [vmem:[%s3293_s4 + $0x64] ss:$8 sps:$4 sm:$0xff]  }
  0x54   : > { %304 = vperm.xlu1 %2294, %v264_v26   ;;  %319 = vperm.xlu0 %2295, %v269_v33  }
  0x58   : > { %310 = vperm.xlu1 %2294, %v266_v30   ;;  %2296 = vset.pattern.permute.xlu0 %v2501_v1 }
  0x5c   : > { %316 = vperm.xlu1 %2294, %v268_v32  }
  0x98   : > { %v678_v37 = vpop.permute.xlu1 %677  ;;  %v672_v38 = vpop.permute.xlu0 %671 }
  0x99   : > { %vm723_vm0 = vcmp.eq.s32.totalorder %v2695_v39, %v678_v37  ;;  %vm718_vm4 = vcmp.eq.s32.totalorder %v2692_v36, %v672_v38  ;;  %vm719_vm7 = vcmp.eq.s32.totalorder %v2695_v39, %v672_v38  ;;  %vm722_vm9 = vcmp.eq.s32.totalorder %v2692_v36, %v678_v37 }
  0x9c   : > { %v681_v40 = vpop.permute.xlu1 %680  ;;  %v675_v41 = vpop.permute.xlu0 %674 }
  0x9d   : > { %vm725_vm1 = vcmp.eq.s32.totalorder %v2695_v39, %v681_v40  ;;  %vm720_vm2 = vcmp.eq.s32.totalorder %v2692_v36, %v675_v41  ;;  %vm721_vm3 = vcmp.eq.s32.totalorder %v2695_v39, %v675_v41  ;;  %vm724_vm10 = vcmp.eq.s32.totalorder %v2692_v36, %v681_v40 }
  0x9e   : > { %vm1963_vm5 = vmpackc.low %vm725_vm1, %vm723_vm0 }
  0x9f   : > { %vm1961_vm6 = vmpackc.low %vm720_vm2, %vm718_vm4 }
  0xa0   : > { %v687_v42 = vpop.permute.xlu1 %686  ;;  %v684_v43 = vpop.permute.xlu0 %683  ;;  %vm1959_vm8 = vmpackc.low %vm721_vm3, %vm719_vm7 }
  0xa1   : > { %1960 = vmatprep.mubr.msk.bf16.mxu1 %vm1959_vm8, %v2503_v44  ;;  %vm729_vm11 = vcmp.eq.s32.totalorder %v2695_v39, %v687_v42  ;;  %vm727_vm12 = vcmp.eq.s32.totalorder %v2695_v39, %v684_v43  ;;  %vm1965_vm13 = vmpackc.low %vm724_vm10, %vm722_vm9  ;;  %vm728_vm15 = vcmp.eq.s32.totalorder %v2692_v36, %v687_v42  ;;  %vm726_vm0 = vcmp.eq.s32.totalorder %v2692_v36, %v684_v43 }
  0xa2   : > { %1962 = vmatmul.mubr.msk.bf16.vlgmr.msra.gmra.mrb[0].mxu1 %vm1961_vm6, %v2503_v44  ;;  %vm1967_vm14 = vmpackc.low %vm729_vm11, %vm727_vm12 }
  0xa3   : > { %1964 = vmatprep.mubr.msk.bf16.mxu1 %vm1963_vm5, %v2503_v44  ;;  %vm1969_vm3 = vmpackc.low %vm728_vm15, %vm726_vm0  ;;  %1363 = vmatpush1.bf16.msra.mxu1 %v2317_v9 }
  0xa4   : > { %v693_v45 = vpop.permute.xlu1 %692  ;;  %v690_v46 = vpop.permute.xlu0 %689  ;;  %1364 = vmatprep.subr.bf16.mxu1 %v2322_v11 }
  0xa5   : > { %vm733_vm1 = vcmp.eq.s32.totalorder %v2695_v39, %v693_v45  ;;  %vm731_vm2 = vcmp.eq.s32.totalorder %v2695_v39, %v690_v46  ;;  %vm732_vm9 = vcmp.eq.s32.totalorder %v2692_v36, %v693_v45  ;;  %vm730_vm10 = vcmp.eq.s32.totalorder %v2692_v36, %v690_v46 }
  0xa6   : > { %vm1971_vm4 = vmpackc.low %vm733_vm1, %vm731_vm2 }
  0xa7   : > { %vm1973_vm15 = vmpackc.low %vm732_vm9, %vm730_vm10  ;;  %1365 = vmatpush1.bf16.msra.mxu1 %v2320_v12 }
  0xa8   : > { %v699_v47 = vpop.permute.xlu1 %698  ;;  %v696_v48 = vpop.permute.xlu0 %695  ;;  %1366 = vmatprep.subr.bf16.mxu1 %v2325_v13 }
  0xa9   : > { %vm737_vm12 = vcmp.eq.s32.totalorder %v2695_v39, %v699_v47  ;;  %vm736_vm1 = vcmp.eq.s32.totalorder %v2692_v36, %v699_v47  ;;  %vm734_vm2 = vcmp.eq.s32.totalorder %v2692_v36, %v696_v48 }
  0xaa   : > { %1966 = vmatmul.mubr.msk.bf16.gmra.mrb[4].mxu1 %vm1965_vm13, %v2503_v44  ;;  %vm735_vm13 = vcmp.eq.s32.totalorder %v2695_v39, %v696_v48 }
  0xab   : > { %1968 = vmatprep.mubr.msk.bf16.mxu1 %vm1967_vm14, %v2503_v44  ;;  %vm1975_vm0 = vmpackc.low %vm737_vm12, %vm735_vm13  ;;  %1367 = vmatpush1.bf16.msra.mxu1 %v2323_v14 }
  0xac   : > { %v2712_v49 = vpop.permute.xlu1 %704  ;;  %v702_v50 = vpop.permute.xlu0 %701  ;;  %1368 = vmatprep.subr.bf16.mxu1 %v2328_v15 }
  0xaf   : > { %1369 = vmatpush1.bf16.msra.mxu1 %v2326_v16 }
  0xb0   : > { %v2718_v51 = vpop.permute.xlu1 %710  ;;  %v2720_v52 = vpop.permute.xlu0 %707  ;;  %1370 = vmatprep.subr.bf16.mxu1 %v2331_v17 }
  0xb2   : > { %1970 = vmatmul.mubr.msk.bf16.gmra.mrb[8].mxu1 %vm1969_vm3, %v2503_v44  ;;  %vm741_vm3 = vcmp.eq.s32.totalorder %v2695_v39, %v2712_v49 }
  0xb3   : > { %1972 = vmatprep.mubr.msk.bf16.mxu1 %vm1971_vm4, %v2503_v44  ;;  %vm739_vm4 = vcmp.eq.s32.totalorder %v2695_v39, %v702_v50  ;;  %1371 = vmatpush1.bf16.msra.mxu1 %v2329_v18 }
  0xb4   : > { %1372 = vmatprep.subr.bf16.mxu1 %v2334_v19 }
  0xb5   : > { %v278_v53 = vpop.permute.xlu1 %277  ;;  %v275_v54 = vpop.permute.xlu0 %274 }
  0xb6   : > { %vm323_vm5 = vcmp.eq.s32.totalorder %v2692_v36, %v278_v53  ;;  %vm321_vm6 = vcmp.eq.s32.totalorder %v2692_v36, %v275_v54  ;;  %vm322_vm7 = vcmp.eq.s32.totalorder %v2695_v39, %v275_v54  ;;  %vm324_vm8 = vcmp.eq.s32.totalorder %v2695_v39, %v278_v53 }
  0xb7   : > { %vm1897_vm11 = vmpackc.low %vm323_vm5, %vm321_vm6  ;;  %1373 = vmatpush1.bf16.msra.mxu1 %v2332_v20 }
  0xb8   : > { %vm1895_vm14 = vmpackc.low %vm324_vm8, %vm322_vm7  ;;  %1374 = vmatprep.subr.bf16.mxu1 %v2337_v21 }
  0xb9   : > { %1896 = vmatprep.mubr.msk.bf16.mxu0 %vm1895_vm14, %v2503_v44  ;;  %vm1977_vm5 = vmpackc.low %vm736_vm1, %vm734_vm2  ;;  %vm740_vm14 = vcmp.eq.s32.totalorder %v2692_v36, %v2712_v49  ;;  %vm743_vm1 = vcmp.eq.s32.totalorder %v2695_v39, %v2720_v52 }
  0xba   : > { %v2733_v55 = vpop.permute.xlu1 %713  ;;  %1898 = vmatmul.mubr.msk.bf16.vlgmr.msra.gmra.mrb[0].mxu0 %vm1897_vm11, %v2503_v44  ;;  %1974 = vmatmul.mubr.msk.bf16.gmra.mrb[12].mxu1 %vm1973_vm15, %v2503_v44  ;;  %v2739_v56 = vpop.permute.xlu0 %716  ;;  %vm1979_vm7 = vmpackc.low %vm741_vm3, %vm739_vm4  ;;  %vm738_vm15 = vcmp.eq.s32.totalorder %v2692_v36, %v702_v50 }
  0xbb   : > { %1976 = vmatprep.mubr.msk.bf16.mxu1 %vm1975_vm0, %v2503_v44  ;;  %2189 = vmatpush3.bf16.msra.mxu0 %v2688_v34  ;;  %vm745_vm0 = vcmp.eq.s32.totalorder %v2695_v39, %v2718_v51 }
  0xbc   : > { %2190 = vmatprep.subr.bf16.mxu0 %v2314_v7  ;;  %1375 = vmatpush1.bf16.msra.mxu1 %v2335_v22 }
  0xbf   : > { %v281_v57 = vpop.permute.xlu1 %280  ;;  %v287_v59 = vpop.permute.xlu0 %286  ;;  %2191 = vmatpush3.bf16.msra.mxu0 %v2314_v7 }
  0xc0   : > { %vm326_vm6 = vcmp.eq.s32.totalorder %v2695_v39, %v281_v57  ;;  %vm325_vm8 = vcmp.eq.s32.totalorder %v2692_v36, %v281_v57  ;;  %vm330_vm13 = vcmp.eq.s32.totalorder %v2695_v39, %v287_v59  ;;  %vm329_vm4 = vcmp.eq.s32.totalorder %v2692_v36, %v287_v59  ;;  %2208 = vmatprep.subr.bf16.mxu0 %v2315_v8 }
  0xc2   : > { %1978 = vmatmul.mubr.msk.bf16.gmra.mrb[16].mxu1 %vm1977_vm5, %v2503_v44 }
  0xc3   : > { %v284_v58 = vpop.permute.xlu1 %283  ;;  %1980 = vmatprep.mubr.msk.bf16.mxu1 %vm1979_vm7, %v2503_v44  ;;  %v296_v61 = vpop.permute.xlu0 %295 }
  0xc4   : > { %vm327_vm9 = vcmp.eq.s32.totalorder %v2692_v36, %v284_v58  ;;  %vm328_vm10 = vcmp.eq.s32.totalorder %v2695_v39, %v284_v58  ;;  %vm336_vm7 = vcmp.eq.s32.totalorder %v2695_v39, %v296_v61 }
  0xc5   : > { %vm1899_vm11 = vmpackc.low %vm328_vm10, %vm326_vm6 }
  0xc6   : > { %vm1901_vm12 = vmpackc.low %vm327_vm9, %vm325_vm8  ;;  %1900 = vmatprep.mubr.msk.bf16.mxu0 %vm1899_vm11, %v2503_v44 }
  0xc7   : > { %v290_v60 = vpop.permute.xlu1 %289  ;;  %1902 = vmatmul.mubr.msk.bf16.gmra.mrb[4].mxu0 %vm1901_vm12, %v2503_v44  ;;  %vm1981_vm6 = vmpackc.low %vm740_vm14, %vm738_vm15  ;;  %vm747_vm12 = vcmp.eq.s32.totalorder %v2695_v39, %v2733_v55  ;;  %vm744_vm14 = vcmp.eq.s32.totalorder %v2692_v36, %v2718_v51  ;;  %vm742_vm15 = vcmp.eq.s32.totalorder %v2692_v36, %v2720_v52  ;;  %v302_v0 = vpop.permute.xlu0 %301 }
  0xc8   : > { %vm332_vm2 = vcmp.eq.s32.totalorder %v2695_v39, %v290_v60  ;;  %vm331_vm3 = vcmp.eq.s32.totalorder %v2692_v36, %v290_v60  ;;  %vm1983_vm8 = vmpackc.low %vm745_vm0, %vm743_vm1 }
  0xc9   : > { %vm1903_vm5 = vmpackc.low %vm332_vm2, %vm330_vm13  ;;  %vm749_vm13 = vcmp.eq.s32.totalorder %v2695_v39, %v2739_v56  ;;  %vm335_vm2 = vcmp.eq.s32.totalorder %v2692_v36, %v296_v61 }
  0xca   : > { %1904 = vmatprep.mubr.msk.bf16.mxu0 %vm1903_vm5, %v2503_v44  ;;  %1982 = vmatmul.mubr.msk.bf16.gmra.mrb[20].mxu1 %vm1981_vm6, %v2503_v44  ;;  %vm1905_vm9 = vmpackc.low %vm331_vm3, %vm329_vm4  ;;  %vm340_vm5 = vcmp.eq.s32.totalorder %v2695_v39, %v302_v0 }
  0xcb   : > { %v293_v62 = vpop.permute.xlu1 %292  ;;  %1984 = vmatprep.mubr.msk.bf16.mxu1 %vm1983_vm8, %v2503_v44  ;;  %vm1987_vm0 = vmpackc.low %vm749_vm13, %vm747_vm12  ;;  %vm746_vm8 = vcmp.eq.s32.totalorder %v2692_v36, %v2733_v55  ;;  %vm339_vm12 = vcmp.eq.s32.totalorder %v2692_v36, %v302_v0  ;;  %v308_v2 = vpop.permute.xlu0 %307 }
  0xcc   : > { %vm334_vm10 = vcmp.eq.s32.totalorder %v2695_v39, %v293_v62  ;;  %vm333_vm1 = vcmp.eq.s32.totalorder %v2692_v36, %v293_v62  ;;  %vm1985_vm3 = vmpackc.low %vm744_vm14, %vm742_vm15  ;;  %vm344_vm14 = vcmp.eq.s32.totalorder %v2695_v39, %v308_v2 }
  0xcd   : > { %vm1907_vm11 = vmpackc.low %vm336_vm7, %vm334_vm10 }
  0xce   : > { %vm1909_vm6 = vmpackc.low %vm335_vm2, %vm333_vm1  ;;  %vm343_vm2 = vcmp.eq.s32.totalorder %v2692_v36, %v308_v2 }
  0xcf   : > { %1906 = vmatmul.mubr.msk.bf16.gmra.mrb[8].mxu0 %vm1905_vm9, %v2503_v44  ;;  %v299_v63 = vpop.permute.xlu1 %298  ;;  %vm748_vm9 = vcmp.eq.s32.totalorder %v2692_v36, %v2739_v56  ;;  %v314_v4 = vpop.permute.xlu0 %313 }
  0xd0   : > { %1908 = vmatprep.mubr.msk.bf16.mxu0 %vm1907_vm11, %v2503_v44  ;;  %vm338_vm4 = vcmp.eq.s32.totalorder %v2695_v39, %v299_v63  ;;  %vm1989_vm10 = vmpackc.low %vm748_vm9, %vm746_vm8  ;;  %vm337_vm11 = vcmp.eq.s32.totalorder %v2692_v36, %v299_v63  ;;  %vm347_vm8 = vcmp.eq.s32.totalorder %v2692_v36, %v314_v4 }
  0xd1   : > { %vm1911_vm7 = vmpackc.low %vm340_vm5, %vm338_vm4  ;;  %vm348_vm4 = vcmp.eq.s32.totalorder %v2695_v39, %v314_v4 }
  0xd2   : > { %1986 = vmatmul.mubr.msk.bf16.gmra.mrb[24].mxu1 %vm1985_vm3, %v2503_v44  ;;  %vm1913_vm15 = vmpackc.low %vm339_vm12, %vm337_vm11 }
  0xd3   : > { %1988 = vmatprep.mubr.msk.bf16.mxu1 %vm1987_vm0, %v2503_v44  ;;  %v305_v1 = vpop.permute.xlu1 %304  ;;  %v320_v6 = vpop.permute.xlu0 %319 }
  0xd4   : > { %vm342_vm13 = vcmp.eq.s32.totalorder %v2695_v39, %v305_v1  ;;  %vm341_vm1 = vcmp.eq.s32.totalorder %v2692_v36, %v305_v1 }
  0xd5   : > { %vm1915_vm0 = vmpackc.low %vm344_vm14, %vm342_vm13  ;;  %vm351_vm14 = vcmp.eq.s32.totalorder %v2692_v36, %v320_v6 }
  0xd6   : > { %vm1917_vm5 = vmpackc.low %vm343_vm2, %vm341_vm1 }
  0xd7   : > { %1910 = vmatmul.mubr.msk.bf16.gmra.mrb[12].mxu0 %vm1909_vm6, %v2503_v44  ;;  %v311_v3 = vpop.permute.xlu1 %310 }
  0xd8   : > { %1912 = vmatprep.mubr.msk.bf16.mxu0 %vm1911_vm7, %v2503_v44  ;;  %vm346_vm3 = vcmp.eq.s32.totalorder %v2695_v39, %v311_v3  ;;  %vm345_vm7 = vcmp.eq.s32.totalorder %v2692_v36, %v311_v3 }
  0xd9   : > { %vm1919_vm6 = vmpackc.low %vm348_vm4, %vm346_vm3 }
  0xda   : > { %1990 = vmatmul.mubr.msk.bf16.gmra.mrb[28].mxu1 %vm1989_vm10, %v2503_v44  ;;  %vm352_vm10 = vcmp.eq.s32.totalorder %v2695_v39, %v320_v6  ;;  %vm1921_vm11 = vmpackc.low %vm347_vm8, %vm345_vm7 }
  0xdb   : > { %1394 = vmatprep.mubr.bf16.mxu1 %v2502_v31  ;;  %v317_v5 = vpop.permute.xlu1 %316 }
  0xdc   : > { %vm350_vm9 = vcmp.eq.s32.totalorder %v2695_v39, %v317_v5  ;;  %vm349_vm13 = vcmp.eq.s32.totalorder %v2692_v36, %v317_v5  ;;  %v2316_v39 = vld [vmem:[%s3291_s2 + $0x8] sm:$0xff]  }
  0xdd   : > { %vm1923_vm12 = vmpackc.low %vm352_vm10, %vm350_vm9 }
  0xdf   : > { %1914 = vmatmul.mubr.msk.bf16.gmra.mrb[16].mxu0 %vm1913_vm15, %v2503_v44  ;;  %vm1925_vm15 = vmpackc.low %vm351_vm14, %vm349_vm13 }
  0xe0   : > { %1916 = vmatprep.mubr.msk.bf16.mxu0 %vm1915_vm0, %v2503_v44  ;;  %vm952_vm0 = vcmask 261120  }
  0xe7   : > { %1918 = vmatmul.mubr.msk.bf16.gmra.mrb[20].mxu0 %vm1917_vm5, %v2503_v44 }
  0xe8   : > { %1920 = vmatprep.mubr.msk.bf16.mxu0 %vm1919_vm6, %v2503_v44 }
  0xef   : > { %1922 = vmatmul.mubr.msk.bf16.gmra.mrb[24].mxu0 %vm1921_vm11, %v2503_v44 }
  0xf0   : > { %1924 = vmatprep.mubr.msk.bf16.mxu0 %vm1923_vm12, %v2503_v44 }
  0xf7   : > { %1926 = vmatmul.mubr.msk.bf16.gmra.mrb[28].mxu0 %vm1925_vm15, %v2503_v44 }
 0x175   : > { %v2120_v23 = vpop.f32.mrb[0].mxu1 }
 0x176   : > { %v2121_v24 = vpop.f32.mrb[1].mxu1 }
 0x177   : > { %v2122_v25 = vadd.f32 %v2121_v24, %v2120_v23  ;;  %v2123_v26 = vpop.f32.mrb[2].mxu1 }
 0x178   : > { %v2124_v27 = vpop.f32.mrb[3].mxu1 }
 0x179   : > { %v2125_v28 = vadd.f32 %v2124_v27, %v2123_v26 }
 0x17b   : > { %v927_v29 = vpack.c.bf16 %v2125_v28, %v2122_v25 }
 0x17d   : > { %v2126_v30 = vpop.f32.mrb[4].mxu1  ;;  %2192 = vmatprep.mubr.msk.bf16.mxu0 %vm952_vm0, %v927_v29 }
 0x17e   : > { %v2127_v32 = vpop.f32.mrb[5].mxu1 }
 0x17f   : > { %v2128_v33 = vadd.f32 %v2127_v32, %v2126_v30  ;;  %v2129_v34 = vpop.f32.mrb[6].mxu1 }
 0x180   : > { %v2130_v36 = vpop.f32.mrb[7].mxu1 }
 0x181   : > { %v2131_v37 = vadd.f32 %v2130_v36, %v2129_v34 }
 0x183   : > { %v928_v38 = vpack.c.bf16 %v2131_v37, %v2128_v33 }
 0x185   : > { %v2132_v40 = vpop.f32.mrb[8].mxu1  ;;  %2193 = vmatmul.mubr.msk.bf16.vlgmr.msra.gmra.mrb[32].mxu0 %vm952_vm0, %v928_v38 }
 0x186   : > { %v2133_v41 = vpop.f32.mrb[9].mxu1  ;;  %2209 = vmatpush3.bf16.msra.mxu0 %v2315_v8 }
 0x187   : > { %v2134_v42 = vadd.f32 %v2133_v41, %v2132_v40  ;;  %v2135_v43 = vpop.f32.mrb[10].mxu1  ;;  %2210 = vmatprep.subr.bf16.mxu0 %v2316_v39 }
 0x188   : > { %v2136_v44 = vpop.f32.mrb[11].mxu1 }
 0x189   : > { %v2137_v45 = vadd.f32 %v2136_v44, %v2135_v43 }
 0x18a   : > { %2211 = vmatpush3.bf16.msra.mxu0 %v2316_v39 }
 0x18b   : > { %v929_v46 = vpack.c.bf16 %v2137_v45, %v2134_v42 }
 0x18d   : > { %v2056_v47 = vpop.f32.mrb[0].mxu0  ;;  %v2138_v48 = vpop.f32.mrb[12].mxu1  ;;  %2196 = vmatprep.mubr.msk.bf16.mxu0 %vm952_vm0, %v929_v46 }
 0x18e   : > { %v2057_v49 = vpop.f32.mrb[1].mxu0  ;;  %v2139_v50 = vpop.f32.mrb[13].mxu1 }
 0x18f   : > { %v2869_v51 = vadd.f32 %v2057_v49, %v2056_v47  ;;  %v2059_v52 = vpop.f32.mrb[2].mxu0  ;;  %v2140_v53 = vadd.f32 %v2139_v50, %v2138_v48  ;;  %v2141_v54 = vpop.f32.mrb[14].mxu1 }
 0x190   : > { %v2060_v55 = vpop.f32.mrb[3].mxu0  ;;  %v2142_v56 = vpop.f32.mrb[15].mxu1 }
 0x191   : > { %v2871_v57 = vadd.f32 %v2060_v55, %v2059_v52  ;;  %v2143_v58 = vadd.f32 %v2142_v56, %v2141_v54 }
 0x193   : > { %v658_v59 = vpack.c.bf16 %v2871_v57, %v2869_v51  ;;  %v930_v60 = vpack.c.bf16 %v2143_v58, %v2140_v53 }
 0x195   : > { %v2144_v61 = vpop.f32.mrb[16].mxu1  ;;  %2197 = vmatmul.mubr.msk.bf16.gmra.mrb[36].mxu0 %vm952_vm0, %v930_v60 }
 0x196   : > { %v2145_v62 = vpop.f32.mrb[17].mxu1 }
 0x197   : > { %v2146_v63 = vadd.f32 %v2145_v62, %v2144_v61  ;;  %v2147_v0 = vpop.f32.mrb[18].mxu1 }
 0x198   : > { %v2148_v1 = vpop.f32.mrb[19].mxu1 }
 0x199   : > { %v2149_v2 = vadd.f32 %v2148_v1, %v2147_v0 }
 0x19a   : > { %v2062_v3 = vpop.f32.mrb[4].mxu0 }
 0x19b   : > { %v2063_v4 = vpop.f32.mrb[5].mxu0  ;;  %v931_v5 = vpack.c.bf16 %v2149_v2, %v2146_v63 }
 0x19c   : > { %v2064_v6 = vadd.f32 %v2063_v4, %v2062_v3  ;;  %v2065_v7 = vpop.f32.mrb[6].mxu0 }
 0x19d   : > { %v2066_v8 = vpop.f32.mrb[7].mxu0  ;;  %v2150_v9 = vpop.f32.mrb[20].mxu1  ;;  %2200 = vmatprep.mubr.msk.bf16.mxu0 %vm952_vm0, %v931_v5 }
 0x19e   : > { %v2067_v10 = vadd.f32 %v2066_v8, %v2065_v7  ;;  %v2151_v11 = vpop.f32.mrb[21].mxu1 }
 0x19f   : > { %v2152_v12 = vadd.f32 %v2151_v11, %v2150_v9  ;;  %v2153_v13 = vpop.f32.mrb[22].mxu1 }
 0x1a0   : > { %v659_v14 = vpack.c.bf16 %v2067_v10, %v2064_v6  ;;  %v2154_v15 = vpop.f32.mrb[23].mxu1 }
 0x1a1   : > { %v2155_v16 = vadd.f32 %v2154_v15, %v2153_v13  ;;  %v2340_v13 = vld [vmem:[%s3293_s4 + $0x74] ss:$8 sps:$4 sm:$0xff]  }
 0x1a2   : > { %v2068_v17 = vpop.f32.mrb[8].mxu0  ;;  %1376 = vmatprep.subr.bf16.mxu1 %v2340_v13 }
 0x1a3   : > { %v2069_v18 = vpop.f32.mrb[9].mxu0  ;;  %v932_v19 = vpack.c.bf16 %v2155_v16, %v2152_v12  ;;  %v2338_v12 = vld [vmem:[%s3293_s4 + $0x70] ss:$8 sps:$4 sm:$0xff]  }
 0x1a4   : > { %v2070_v20 = vadd.f32 %v2069_v18, %v2068_v17  ;;  %v2071_v21 = vpop.f32.mrb[10].mxu0  ;;  %1377 = vmatpush1.bf16.msra.mxu1 %v2338_v12 }
 0x1a5   : > { %v2072_v22 = vpop.f32.mrb[11].mxu0  ;;  %v2156_v23 = vpop.f32.mrb[24].mxu1  ;;  %2201 = vmatmul.mubr.msk.bf16.gmra.mrb[40].mxu0 %vm952_vm0, %v932_v19 }
 0x1a6   : > { %v2073_v24 = vadd.f32 %v2072_v22, %v2071_v21  ;;  %v2157_v25 = vpop.f32.mrb[25].mxu1 }
 0x1a7   : > { %v2158_v26 = vadd.f32 %v2157_v25, %v2156_v23  ;;  %v2159_v27 = vpop.f32.mrb[26].mxu1 }
 0x1a8   : > { %v660_v28 = vpack.c.bf16 %v2073_v24, %v2070_v20  ;;  %v2160_v29 = vpop.f32.mrb[27].mxu1 }
 0x1a9   : > { %v2161_v30 = vadd.f32 %v2160_v29, %v2159_v27 }
 0x1aa   : > { %v2074_v32 = vpop.f32.mrb[12].mxu0 }
 0x1ab   : > { %v2075_v33 = vpop.f32.mrb[13].mxu0  ;;  %v933_v34 = vpack.c.bf16 %v2161_v30, %v2158_v26 }
 0x1ac   : > { %v2076_v36 = vadd.f32 %v2075_v33, %v2074_v32  ;;  %v2077_v37 = vpop.f32.mrb[14].mxu0 }
 0x1ad   : > { %v2078_v38 = vpop.f32.mrb[15].mxu0  ;;  %v2162_v39 = vpop.f32.mrb[28].mxu1  ;;  %2204 = vmatprep.mubr.msk.bf16.mxu0 %vm952_vm0, %v933_v34 }
 0x1ae   : > { %v2079_v40 = vadd.f32 %v2078_v38, %v2077_v37  ;;  %v2163_v41 = vpop.f32.mrb[29].mxu1 }
 0x1af   : > { %v2164_v42 = vadd.f32 %v2163_v41, %v2162_v39  ;;  %v2165_v43 = vpop.f32.mrb[30].mxu1 }
 0x1b0   : > { %v661_v44 = vpack.c.bf16 %v2079_v40, %v2076_v36  ;;  %v2166_v45 = vpop.f32.mrb[31].mxu1 }
 0x1b1   : > { %v2167_v46 = vadd.f32 %v2166_v45, %v2165_v43 }
 0x1b2   : > { %v2080_v47 = vpop.f32.mrb[16].mxu0 }
 0x1b3   : > { %v2081_v48 = vpop.f32.mrb[17].mxu0  ;;  %v934_v49 = vpack.c.bf16 %v2167_v46, %v2164_v42 }
 0x1b4   : > { %v2082_v50 = vadd.f32 %v2081_v48, %v2080_v47  ;;  %v2083_v51 = vpop.f32.mrb[18].mxu0 }
 0x1b5   : > { %v2084_v52 = vpop.f32.mrb[19].mxu0  ;;  %2205 = vmatmul.mubr.msk.bf16.gmra.mrb[44].mxu0 %vm952_vm0, %v934_v49 }
 0x1b6   : > { %v2085_v53 = vadd.f32 %v2084_v52, %v2083_v51  ;;  %2212 = vmatprep.mubr.msk.bf16.mxu0 %vm952_vm0, %v658_v59 }
 0x1b8   : > { %v662_v54 = vpack.c.bf16 %v2085_v53, %v2082_v50 }
 0x1ba   : > { %v2086_v55 = vpop.f32.mrb[20].mxu0 }
 0x1bb   : > { %v2087_v56 = vpop.f32.mrb[21].mxu0 }
 0x1bc   : > { %v2088_v57 = vadd.f32 %v2087_v56, %v2086_v55  ;;  %v2089_v58 = vpop.f32.mrb[22].mxu0 }
 0x1bd   : > { %v2090_v60 = vpop.f32.mrb[23].mxu0  ;;  %2213 = vmatmul.mubr.msk.bf16.vlgmr.msra.gmra.mrb[32].mxu0 %vm952_vm0, %v659_v14  ;;  %v2015_v14 = vld [vmem:[%s3292_s3] ss:$0 sm:$0xff] }
 0x1be   : > { %v2091_v61 = vadd.f32 %v2090_v60, %v2089_v58  ;;  %2216 = vmatprep.mubr.msk.bf16.mxu0 %vm952_vm0, %v660_v28 }
 0x1c0   : > { %v663_v62 = vpack.c.bf16 %v2091_v61, %v2088_v57 }
 0x1c2   : > { %v2092_v63 = vpop.f32.mrb[24].mxu0 }
 0x1c3   : > { %v2093_v0 = vpop.f32.mrb[25].mxu0 }
 0x1c4   : > { %v2094_v1 = vadd.f32 %v2093_v0, %v2092_v63  ;;  %v2095_v2 = vpop.f32.mrb[26].mxu0 }
 0x1c5   : > { %v2096_v3 = vpop.f32.mrb[27].mxu0  ;;  %2217 = vmatmul.mubr.msk.bf16.gmra.mrb[36].mxu0 %vm952_vm0, %v661_v44 }
 0x1c6   : > { %v2097_v59 = vadd.f32 %v2096_v3, %v2095_v2  ;;  %2220 = vmatprep.mubr.msk.bf16.mxu0 %vm952_vm0, %v662_v54 }
 0x1c8   : > { %v664_v4 = vpack.c.bf16 %v2097_v59, %v2094_v1 }
 0x1ca   : > { %v2098_v5 = vpop.f32.mrb[28].mxu0 }
 0x1cb   : > { %v2099_v6 = vpop.f32.mrb[29].mxu0 }
 0x1cc   : > { %v2100_v7 = vadd.f32 %v2099_v6, %v2098_v5  ;;  %v2101_v8 = vpop.f32.mrb[30].mxu0 }
 0x1cd   : > { %v2102_v9 = vpop.f32.mrb[31].mxu0  ;;  %2221 = vmatmul.mubr.msk.bf16.gmra.mrb[40].mxu0 %vm952_vm0, %v663_v62 }
 0x1ce   : > { %v2103_v10 = vadd.f32 %v2102_v9, %v2101_v8  ;;  %2224 = vmatprep.mubr.msk.bf16.mxu0 %vm952_vm0, %v664_v4  ;;  %v1273_v9 = vshrl.u32 %v270_v35, 7 }
 0x1d0   : > { %v665_v11 = vpack.c.bf16 %v2103_v10, %v2100_v7  ;;  %v1274_v10 = vsub.s32 0, %v1273_v9  ;;  %v1278_v12 = vsub.s32 1, %v1273_v9 }
 0x1d5   : > { %2225 = vmatmul.mubr.msk.bf16.gmra.mrb[44].mxu0 %vm952_vm0, %v665_v11  ;;  %v1270_v11 = vld [vmem:[%s3294_s5] sm:$0x3] }
 0x1d6   : > { %v2908_v13 = vrot.slane %v1270_v11, %v1274_v10 }
 0x290   : > { %v2214_v15 = vpop.f32.mrb[32].mxu0 }
 0x291   : > { %v1216_v16 = vadd.f32 %v2214_v15, %v2015_v14  ;;  %v1144_v17 = vpop.f32.mrb[33].mxu0 }
 0x292   : > { %v1214_v18 = vadd.f32 %v2015_v14, %v1144_v17  ;;  %v2215_v19 = vpop.f32.mrb[34].mxu0 }
 0x293   : > { %v1217_v20 = vadd.f32 %v2215_v19, %v2015_v14  ;;  %v1147_v21 = vpop.f32.mrb[35].mxu0  ;;  %v1232_v23 = vmax.f32 %v1216_v16, 0.0 }
 0x294   : > { %v1215_v22 = vadd.f32 %v2015_v14, %v1147_v21  ;;  %v1230_v25 = vmax.f32 %v1214_v18, 0.0 }
 0x295   : > { %v1233_v24 = vmax.f32 %v1217_v20, 0.0 }
 0x296   : > { %v1231_v26 = vmax.f32 %v1215_v22, 0.0 }
 0x297   : > { %v1247_v27 = vpack.c.bf16 %v1233_v24, %v1232_v23 }
 0x298   : > { %v1246_v28 = vpack.c.bf16 %v1231_v26, %v1230_v25  ;;  %v2218_v29 = vpop.f32.mrb[36].mxu0 }
 0x299   : > { %v1220_v30 = vadd.f32 %v2218_v29, %v2015_v14  ;;  %v1160_v32 = vpop.f32.mrb[37].mxu0 }
 0x29a   : > { %v1218_v33 = vadd.f32 %v2015_v14, %v1160_v32  ;;  %v2219_v34 = vpop.f32.mrb[38].mxu0  ;;  %1395 = vmatmul.mubr.bf16.vlgmr.msra.gmra.mrb[32].mxu1 %v1246_v28 }
 0x29b   : > { %v1221_v36 = vadd.f32 %v2219_v34, %v2015_v14  ;;  %v1163_v37 = vpop.f32.mrb[39].mxu0  ;;  %1404 = vmatprep.mubr.bf16.mxu1 %v2502_v31  ;;  %v1236_v39 = vmax.f32 %v1220_v30, 0.0 }
 0x29c   : > { %v1219_v38 = vadd.f32 %v2015_v14, %v1163_v37  ;;  %v1234_v41 = vmax.f32 %v1218_v33, 0.0 }
 0x29d   : > { %v1237_v40 = vmax.f32 %v1221_v36, 0.0 }
 0x29e   : > { %v1235_v42 = vmax.f32 %v1219_v38, 0.0 }
 0x29f   : > { %v1249_v43 = vpack.c.bf16 %v1237_v40, %v1236_v39 }
 0x2a0   : > { %v1248_v44 = vpack.c.bf16 %v1235_v42, %v1234_v41  ;;  %v2222_v45 = vpop.f32.mrb[40].mxu0 }
 0x2a1   : > { %v1224_v46 = vadd.f32 %v2222_v45, %v2015_v14  ;;  %v1176_v47 = vpop.f32.mrb[41].mxu0 }
 0x2a2   : > { %v1222_v48 = vadd.f32 %v2015_v14, %v1176_v47  ;;  %v2223_v49 = vpop.f32.mrb[42].mxu0  ;;  %1405 = vmatmul.mubr.bf16.gmra.mrb[36].mxu1 %v1247_v27 }
 0x2a3   : > { %v1225_v50 = vadd.f32 %v2223_v49, %v2015_v14  ;;  %v1179_v51 = vpop.f32.mrb[43].mxu0  ;;  %1414 = vmatprep.mubr.bf16.mxu1 %v2502_v31  ;;  %v1240_v53 = vmax.f32 %v1224_v46, 0.0 }
 0x2a4   : > { %v1223_v52 = vadd.f32 %v2015_v14, %v1179_v51  ;;  %v1238_v55 = vmax.f32 %v1222_v48, 0.0 }
 0x2a5   : > { %v1241_v54 = vmax.f32 %v1225_v50, 0.0 }
 0x2a6   : > { %v1239_v56 = vmax.f32 %v1223_v52, 0.0 }
 0x2a7   : > { %v1251_v57 = vpack.c.bf16 %v1241_v54, %v1240_v53 }
 0x2a8   : > { %v1250_v58 = vpack.c.bf16 %v1239_v56, %v1238_v55  ;;  %v2226_v60 = vpop.f32.mrb[44].mxu0 }
 0x2a9   : > { %v1228_v61 = vadd.f32 %v2226_v60, %v2015_v14  ;;  %v1192_v62 = vpop.f32.mrb[45].mxu0 }
 0x2aa   : > { %v1226_v63 = vadd.f32 %v2015_v14, %v1192_v62  ;;  %v2227_v0 = vpop.f32.mrb[46].mxu0  ;;  %1415 = vmatmul.mubr.bf16.gmra.mrb[40].mxu1 %v1248_v44 }
 0x2ab   : > { %v1229_v1 = vadd.f32 %v2227_v0, %v2015_v14  ;;  %v1195_v2 = vpop.f32.mrb[47].mxu0  ;;  %1424 = vmatprep.mubr.bf16.mxu1 %v2502_v31  ;;  %v1244_v59 = vmax.f32 %v1228_v61, 0.0 }
 0x2ac   : > { %v1227_v3 = vadd.f32 %v2015_v14, %v1195_v2  ;;  %v1242_v5 = vmax.f32 %v1226_v63, 0.0  ;;  %v2910_v14 = vrot.slane %v1270_v11, %v1278_v12 }
 0x2ad   : > { %v1245_v4 = vmax.f32 %v1229_v1, 0.0 }
 0x2ae   : > { %v1243_v6 = vmax.f32 %v1227_v3, 0.0 }
 0x2af   : > { %v1253_v7 = vpack.c.bf16 %v1245_v4, %v1244_v59 }
 0x2b0   : > { %v1252_v8 = vpack.c.bf16 %v1243_v6, %v1242_v5 }
 0x2b2   : > { %1425 = vmatmul.mubr.bf16.gmra.mrb[44].mxu1 %v1249_v43 }
 0x2b3   : > { %1434 = vmatprep.mubr.bf16.mxu1 %v2502_v31 }
 0x2ba   : > { %1435 = vmatmul.mubr.bf16.gmra.mrb[48].mxu1 %v1250_v58 }
 0x2bb   : > { %1444 = vmatprep.mubr.bf16.mxu1 %v2502_v31 }
 0x2c2   : > { %1445 = vmatmul.mubr.bf16.gmra.mrb[52].mxu1 %v1251_v57 }
 0x2c3   : > { %1454 = vmatprep.mubr.bf16.mxu1 %v2502_v31 }
 0x2ca   : > { %1455 = vmatmul.mubr.bf16.gmra.mrb[56].mxu1 %v1252_v8 }
 0x2cb   : > { %1464 = vmatprep.mubr.bf16.mxu1 %v2502_v31 }
 0x2d2   : > { %1465 = vmatmul.mubr.bf16.gmra.mrb[60].mxu1 %v1253_v7 }
 0x36d   : > { %v1396_v15 = vpop.f32.mrb[32].mxu1 }
 0x36e   : > { %v2913_v16 = vadd.f32 %v1396_v15, %v2908_v13  ;;  %v1398_v17 = vpop.f32.mrb[33].mxu1 }
 0x36f   : > { %v2916_v31 = vadd.f32 %v1398_v17, %v2910_v14  ;;  %v1400_v18 = vpop.f32.mrb[34].mxu1 }
 0x370   : > { %v2919_v35 = vadd.f32 %v1400_v18, %v2908_v13  ;;  %v1402_v19 = vpop.f32.mrb[35].mxu1 }
 0x371   : > { %v2922_v20 = vadd.f32 %v1402_v19, %v2910_v14  ;;  %v1475_v21 = vmax.f32 %v2913_v16, %v2916_v31 }
 0x373   : > { %1476 = vmax.xlane.f32.xlu1 %v1475_v21  ;;  %v1478_v22 = vmax.f32 %v2919_v35, %v2922_v20 }
 0x375   : > { %v1406_v23 = vpop.f32.mrb[36].mxu1  ;;  %1479 = vmax.xlane.f32.xlu0 %v1478_v22 }
 0x376   : > { %v2929_v24 = vadd.f32 %v1406_v23, %v2908_v13  ;;  %v1408_v25 = vpop.f32.mrb[37].mxu1 }
 0x377   : > { %v2932_v26 = vadd.f32 %v1408_v25, %v2910_v14  ;;  %v1410_v27 = vpop.f32.mrb[38].mxu1 }
 0x378   : > { %v2935_v28 = vadd.f32 %v1410_v27, %v2908_v13  ;;  %v1412_v29 = vpop.f32.mrb[39].mxu1 }
 0x379   : > { %v2938_v30 = vadd.f32 %v1412_v29, %v2910_v14  ;;  %v1481_v32 = vmax.f32 %v2929_v24, %v2932_v26 }
 0x37b   : > { %1482 = vmax.xlane.f32.xlu0 %v1481_v32  ;;  %v1484_v33 = vmax.f32 %v2935_v28, %v2938_v30 }
 0x37d   : > { %1485 = vmax.xlane.f32.xlu1 %v1484_v33  ;;  %v1416_v34 = vpop.f32.mrb[40].mxu1 }
 0x37e   : > { %v2945_v36 = vadd.f32 %v1416_v34, %v2908_v13  ;;  %v1418_v37 = vpop.f32.mrb[41].mxu1 }
 0x37f   : > { %v2948_v38 = vadd.f32 %v1418_v37, %v2910_v14  ;;  %v1420_v39 = vpop.f32.mrb[42].mxu1 }
 0x380   : > { %v2951_v40 = vadd.f32 %v1420_v39, %v2908_v13  ;;  %v1422_v41 = vpop.f32.mrb[43].mxu1 }
 0x381   : > { %v2954_v42 = vadd.f32 %v1422_v41, %v2910_v14  ;;  %v1487_v43 = vmax.f32 %v2945_v36, %v2948_v38 }
 0x383   : > { %1488 = vmax.xlane.f32.xlu0 %v1487_v43  ;;  %v1490_v44 = vmax.f32 %v2951_v40, %v2954_v42 }
 0x385   : > { %v1426_v45 = vpop.f32.mrb[44].mxu1  ;;  %1491 = vmax.xlane.f32.xlu1 %v1490_v44 }
 0x386   : > { %v2961_v46 = vadd.f32 %v1426_v45, %v2908_v13  ;;  %v1428_v47 = vpop.f32.mrb[45].mxu1 }
 0x387   : > { %v2964_v48 = vadd.f32 %v1428_v47, %v2910_v14  ;;  %v1430_v49 = vpop.f32.mrb[46].mxu1 }
 0x388   : > { %v2967_v50 = vadd.f32 %v1430_v49, %v2908_v13  ;;  %v1432_v51 = vpop.f32.mrb[47].mxu1 }
 0x389   : > { %v2970_v52 = vadd.f32 %v1432_v51, %v2910_v14  ;;  %v1493_v53 = vmax.f32 %v2961_v46, %v2964_v48 }
 0x38b   : > { %1494 = vmax.xlane.f32.xlu0 %v1493_v53  ;;  %v1496_v54 = vmax.f32 %v2967_v50, %v2970_v52 }
 0x38d   : > { %1497 = vmax.xlane.f32.xlu1 %v1496_v54  ;;  %v1436_v55 = vpop.f32.mrb[48].mxu1 }
 0x38e   : > { %v2977_v56 = vadd.f32 %v1436_v55, %v2908_v13  ;;  %v1438_v57 = vpop.f32.mrb[49].mxu1 }
 0x38f   : > { %v2980_v58 = vadd.f32 %v1438_v57, %v2910_v14  ;;  %v1440_v60 = vpop.f32.mrb[50].mxu1 }
 0x390   : > { %v2983_v61 = vadd.f32 %v1440_v60, %v2908_v13  ;;  %v1442_v62 = vpop.f32.mrb[51].mxu1 }
 0x391   : > { %v2986_v63 = vadd.f32 %v1442_v62, %v2910_v14  ;;  %v1499_v0 = vmax.f32 %v2977_v56, %v2980_v58 }
 0x393   : > { %1500 = vmax.xlane.f32.xlu0 %v1499_v0  ;;  %v1502_v1 = vmax.f32 %v2983_v61, %v2986_v63 }
 0x395   : > { %v1446_v2 = vpop.f32.mrb[52].mxu1  ;;  %1503 = vmax.xlane.f32.xlu1 %v1502_v1 }
 0x396   : > { %v2993_v3 = vadd.f32 %v1446_v2, %v2908_v13  ;;  %v1448_v59 = vpop.f32.mrb[53].mxu1 }
 0x397   : > { %v2996_v4 = vadd.f32 %v1448_v59, %v2910_v14  ;;  %v1450_v5 = vpop.f32.mrb[54].mxu1 }
 0x398   : > { %v2999_v6 = vadd.f32 %v1450_v5, %v2908_v13  ;;  %v1452_v7 = vpop.f32.mrb[55].mxu1 }
 0x399   : > { %v3002_v8 = vadd.f32 %v1452_v7, %v2910_v14  ;;  %v1505_v9 = vmax.f32 %v2993_v3, %v2996_v4 }
 0x39b   : > { %1506 = vmax.xlane.f32.xlu0 %v1505_v9  ;;  %v1508_v10 = vmax.f32 %v2999_v6, %v3002_v8 }
 0x39d   : > { %1509 = vmax.xlane.f32.xlu1 %v1508_v10  ;;  %v1456_v11 = vpop.f32.mrb[56].mxu1 }
 0x39e   : > { %v3009_v12 = vadd.f32 %v1456_v11, %v2908_v13  ;;  %v1458_v15 = vpop.f32.mrb[57].mxu1 }
 0x39f   : > { %v3012_v17 = vadd.f32 %v1458_v15, %v2910_v14  ;;  %v1460_v18 = vpop.f32.mrb[58].mxu1 }
 0x3a0   : > { %v3015_v19 = vadd.f32 %v1460_v18, %v2908_v13  ;;  %v1462_v21 = vpop.f32.mrb[59].mxu1 }
 0x3a1   : > { %v3018_v22 = vadd.f32 %v1462_v21, %v2910_v14  ;;  %v1511_v23 = vmax.f32 %v3009_v12, %v3012_v17 }
 0x3a3   : > { %1512 = vmax.xlane.f32.xlu0 %v1511_v23  ;;  %v1514_v25 = vmax.f32 %v3015_v19, %v3018_v22 }
 0x3a5   : > { %v1466_v27 = vpop.f32.mrb[60].mxu1  ;;  %1515 = vmax.xlane.f32.xlu1 %v1514_v25 }
 0x3a6   : > { %v3025_v29 = vadd.f32 %v1466_v27, %v2908_v13  ;;  %v1468_v32 = vpop.f32.mrb[61].mxu1 }
 0x3a7   : > { %v3028_v33 = vadd.f32 %v1468_v32, %v2910_v14  ;;  %v1470_v34 = vpop.f32.mrb[62].mxu1 }
 0x3a8   : > { %v3031_v37 = vadd.f32 %v1470_v34, %v2908_v13  ;;  %v1472_v39 = vpop.f32.mrb[63].mxu1 }
 0x3a9   : > { %v3034_v41 = vadd.f32 %v1472_v39, %v2910_v14  ;;  %v1517_v43 = vmax.f32 %v3025_v29, %v3028_v33 }
 0x3ab   : > { %1518 = vmax.xlane.f32.xlu0 %v1517_v43  ;;  %v1520_v44 = vmax.f32 %v3031_v37, %v3034_v41 }
 0x3ad   : > { %1521 = vmax.xlane.f32.xlu1 %v1520_v44 }
 0x400   : > { %v1477_v45 = vpop.xlane.xlu1 %1476 }
 0x401   : > { %v3041_v47 = vsub.f32 %v2913_v16, %v1477_v45  ;;  %v3044_v49 = vsub.f32 %v2916_v31, %v1477_v45 }
 0x402   : > { %v1480_v13 = vpop.xlane.xlu0 %1479 }
 0x403   : > { %v1555_v51 = vmul.f32 1.442695, %v3041_v47  ;;  %v1557_v14 = vmul.f32 1.442695, %v3044_v49  ;;  %v3049_v53 = vsub.f32 %v2919_v35, %v1480_v13  ;;  %v3052_v54 = vsub.f32 %v2922_v20, %v1480_v13 }
 0x405   : > { %2341 = vpow2.f32 %v1555_v51  ;;  %v1559_v55 = vmul.f32 1.442695, %v3049_v53  ;;  %v1561_v16 = vmul.f32 1.442695, %v3052_v54 }
 0x406   : > { %2343 = vpow2.f32 %v1557_v14 }
 0x407   : > { %2345 = vpow2.f32 %v1559_v55 }
 0x408   : > { %2347 = vpow2.f32 %v1561_v16  ;;  %v1483_v31 = vpop.xlane.xlu0 %1482 }
 0x409   : > { %v3057_v57 = vsub.f32 %v2929_v24, %v1483_v31  ;;  %v3060_v60 = vsub.f32 %v2932_v26, %v1483_v31 }
 0x40a   : > { %v1486_v35 = vpop.xlane.xlu1 %1485 }
 0x40b   : > { %v1563_v62 = vmul.f32 1.442695, %v3057_v57  ;;  %v1565_v20 = vmul.f32 1.442695, %v3060_v60  ;;  %v3065_v0 = vsub.f32 %v2935_v28, %v1486_v35  ;;  %v3068_v1 = vsub.f32 %v2938_v30, %v1486_v35 }
 0x40d   : > { %2349 = vpow2.f32 %v1563_v62  ;;  %v1567_v2 = vmul.f32 1.442695, %v3065_v0  ;;  %v1569_v24 = vmul.f32 1.442695, %v3068_v1 }
 0x40e   : > { %2351 = vpow2.f32 %v1565_v20 }
 0x40f   : > { %v2342_v59 = vpop.eup %2341  ;;  %2353 = vpow2.f32 %v1567_v2 }
 0x410   : > { %v2344_v26 = vpop.eup %2343  ;;  %2355 = vpow2.f32 %v1569_v24  ;;  %v1489_v5 = vpop.xlane.xlu0 %1488 }
 0x411   : > { %v2346_v7 = vpop.eup %2345  ;;  %v3073_v9 = vsub.f32 %v2945_v36, %v1489_v5  ;;  %v3076_v28 = vsub.f32 %v2948_v38, %v1489_v5  ;;  %v1619_v30 = vadd.f32 %v2344_v26, %v2342_v59 }
 0x412   : > { %v2348_v10 = vpop.eup %2347  ;;  %v1492_v11 = vpop.xlane.xlu1 %1491 }
 0x413   : > { %v1571_v15 = vmul.f32 1.442695, %v3073_v9  ;;  %v1573_v18 = vmul.f32 1.442695, %v3076_v28  ;;  %v3081_v21 = vsub.f32 %v2951_v40, %v1492_v11  ;;  %v3084_v23 = vsub.f32 %v2954_v42, %v1492_v11  ;;  %1620 = vadd.xlane.f32.xlu0 %v1619_v30 }
 0x414   : > { %v1622_v25 = vadd.f32 %v2348_v10, %v2346_v7 }
 0x415   : > { %2357 = vpow2.f32 %v1571_v15  ;;  %v1575_v36 = vmul.f32 1.442695, %v3081_v21  ;;  %v1577_v38 = vmul.f32 1.442695, %v3084_v23 }
 0x416   : > { %2359 = vpow2.f32 %v1573_v18  ;;  %1623 = vadd.xlane.f32.xlu1 %v1622_v25 }
 0x417   : > { %v2350_v27 = vpop.eup %2349  ;;  %2361 = vpow2.f32 %v1575_v36 }
 0x418   : > { %v2352_v32 = vpop.eup %2351  ;;  %2363 = vpow2.f32 %v1577_v38  ;;  %v1495_v34 = vpop.xlane.xlu0 %1494 }
 0x419   : > { %v2354_v39 = vpop.eup %2353  ;;  %v3089_v40 = vsub.f32 %v2961_v46, %v1495_v34  ;;  %v3092_v42 = vsub.f32 %v2964_v48, %v1495_v34  ;;  %v1625_v43 = vadd.f32 %v2352_v32, %v2350_v27 }
 0x41a   : > { %v2356_v44 = vpop.eup %2355  ;;  %v1498_v45 = vpop.xlane.xlu1 %1497 }
 0x41b   : > { %v1579_v13 = vmul.f32 1.442695, %v3089_v40  ;;  %v1581_v51 = vmul.f32 1.442695, %v3092_v42  ;;  %v3097_v14 = vsub.f32 %v2967_v50, %v1498_v45  ;;  %v3100_v55 = vsub.f32 %v2970_v52, %v1498_v45  ;;  %1626 = vadd.xlane.f32.xlu0 %v1625_v43 }
 0x41c   : > { %v1628_v16 = vadd.f32 %v2356_v44, %v2354_v39 }
 0x41d   : > { %2365 = vpow2.f32 %v1579_v13  ;;  %v1583_v46 = vmul.f32 1.442695, %v3097_v14  ;;  %v1585_v48 = vmul.f32 1.442695, %v3100_v55 }
 0x41e   : > { %2367 = vpow2.f32 %v1581_v51  ;;  %1629 = vadd.xlane.f32.xlu1 %v1628_v16 }
 0x41f   : > { %v2358_v31 = vpop.eup %2357  ;;  %2369 = vpow2.f32 %v1583_v46 }
 0x420   : > { %v2360_v35 = vpop.eup %2359  ;;  %2371 = vpow2.f32 %v1585_v48  ;;  %v1501_v62 = vpop.xlane.xlu0 %1500 }
 0x421   : > { %v2362_v20 = vpop.eup %2361  ;;  %v3105_v50 = vsub.f32 %v2977_v56, %v1501_v62  ;;  %v3108_v52 = vsub.f32 %v2980_v58, %v1501_v62  ;;  %v1631_v2 = vadd.f32 %v2360_v35, %v2358_v31 }
 0x422   : > { %v2364_v24 = vpop.eup %2363  ;;  %v1504_v59 = vpop.xlane.xlu1 %1503 }
 0x423   : > { %v1587_v26 = vmul.f32 1.442695, %v3105_v50  ;;  %v1589_v5 = vmul.f32 1.442695, %v3108_v52  ;;  %v3113_v7 = vsub.f32 %v2983_v61, %v1504_v59  ;;  %v3116_v30 = vsub.f32 %v2986_v63, %v1504_v59  ;;  %1632 = vadd.xlane.f32.xlu0 %v1631_v2 }
 0x424   : > { %v1634_v10 = vadd.f32 %v2364_v24, %v2362_v20 }
 0x425   : > { %2373 = vpow2.f32 %v1587_v26  ;;  %v1591_v56 = vmul.f32 1.442695, %v3113_v7  ;;  %v1593_v58 = vmul.f32 1.442695, %v3116_v30 }
 0x426   : > { %2375 = vpow2.f32 %v1589_v5  ;;  %1635 = vadd.xlane.f32.xlu1 %v1634_v10 }
 0x427   : > { %v2366_v11 = vpop.eup %2365  ;;  %2377 = vpow2.f32 %v1591_v56 }
 0x428   : > { %v2368_v15 = vpop.eup %2367  ;;  %2379 = vpow2.f32 %v1593_v58  ;;  %v1507_v18 = vpop.xlane.xlu0 %1506 }
 0x429   : > { %v2370_v25 = vpop.eup %2369  ;;  %v3121_v61 = vsub.f32 %v2993_v3, %v1507_v18  ;;  %v3124_v63 = vsub.f32 %v2996_v4, %v1507_v18  ;;  %v1637_v36 = vadd.f32 %v2368_v15, %v2366_v11 }
 0x42a   : > { %v2372_v38 = vpop.eup %2371  ;;  %v1510_v27 = vpop.xlane.xlu1 %1509 }
 0x42b   : > { %v1595_v32 = vmul.f32 1.442695, %v3121_v61  ;;  %v1597_v34 = vmul.f32 1.442695, %v3124_v63  ;;  %v3129_v39 = vsub.f32 %v2999_v6, %v1510_v27  ;;  %v3132_v43 = vsub.f32 %v3002_v8, %v1510_v27  ;;  %1638 = vadd.xlane.f32.xlu0 %v1637_v36 }
 0x42c   : > { %v1640_v44 = vadd.f32 %v2372_v38, %v2370_v25 }
 0x42d   : > { %2381 = vpow2.f32 %v1595_v32  ;;  %v1599_v3 = vmul.f32 1.442695, %v3129_v39  ;;  %v1601_v4 = vmul.f32 1.442695, %v3132_v43 }
 0x42e   : > { %2383 = vpow2.f32 %v1597_v34  ;;  %1641 = vadd.xlane.f32.xlu1 %v1640_v44 }
 0x42f   : > { %v2374_v45 = vpop.eup %2373  ;;  %2385 = vpow2.f32 %v1599_v3 }
 0x430   : > { %v2376_v13 = vpop.eup %2375  ;;  %2387 = vpow2.f32 %v1601_v4  ;;  %v1513_v51 = vpop.xlane.xlu0 %1512 }
 0x431   : > { %v2378_v16 = vpop.eup %2377  ;;  %v3137_v6 = vsub.f32 %v3009_v12, %v1513_v51  ;;  %v3140_v8 = vsub.f32 %v3012_v17, %v1513_v51  ;;  %v1643_v46 = vadd.f32 %v2376_v13, %v2374_v45 }
 0x432   : > { %v2380_v48 = vpop.eup %2379  ;;  %v1516_v31 = vpop.xlane.xlu1 %1515 }
 0x433   : > { %v1603_v35 = vmul.f32 1.442695, %v3137_v6  ;;  %v1605_v62 = vmul.f32 1.442695, %v3140_v8  ;;  %v3145_v20 = vsub.f32 %v3015_v19, %v1516_v31  ;;  %v3148_v2 = vsub.f32 %v3018_v22, %v1516_v31  ;;  %1644 = vadd.xlane.f32.xlu0 %v1643_v46 }
 0x434   : > { %v1646_v24 = vadd.f32 %v2380_v48, %v2378_v16 }
 0x435   : > { %2389 = vpow2.f32 %v1603_v35  ;;  %v1607_v12 = vmul.f32 1.442695, %v3145_v20  ;;  %v1609_v17 = vmul.f32 1.442695, %v3148_v2 }
 0x436   : > { %2391 = vpow2.f32 %v1605_v62  ;;  %1647 = vadd.xlane.f32.xlu1 %v1646_v24 }
 0x437   : > { %v2382_v59 = vpop.eup %2381  ;;  %2393 = vpow2.f32 %v1607_v12 }
 0x438   : > { %v2384_v26 = vpop.eup %2383  ;;  %2395 = vpow2.f32 %v1609_v17  ;;  %v1519_v5 = vpop.xlane.xlu0 %1518 }
 0x439   : > { %v2386_v10 = vpop.eup %2385  ;;  %v3153_v19 = vsub.f32 %v3025_v29, %v1519_v5  ;;  %v3156_v22 = vsub.f32 %v3028_v33, %v1519_v5  ;;  %v1649_v56 = vadd.f32 %v2384_v26, %v2382_v59 }
 0x43a   : > { %v2388_v58 = vpop.eup %2387  ;;  %v1522_v11 = vpop.xlane.xlu1 %1521 }
 0x43b   : > { %v1611_v15 = vmul.f32 1.442695, %v3153_v19  ;;  %v1613_v18 = vmul.f32 1.442695, %v3156_v22  ;;  %v3161_v25 = vsub.f32 %v3031_v37, %v1522_v11  ;;  %v3164_v36 = vsub.f32 %v3034_v41, %v1522_v11  ;;  %1650 = vadd.xlane.f32.xlu0 %v1649_v56 }
 0x43c   : > { %v1652_v38 = vadd.f32 %v2388_v58, %v2386_v10 }
 0x43d   : > { %2397 = vpow2.f32 %v1611_v15  ;;  %v1615_v29 = vmul.f32 1.442695, %v3161_v25  ;;  %v1617_v33 = vmul.f32 1.442695, %v3164_v36 }
 0x43e   : > { %2399 = vpow2.f32 %v1613_v18  ;;  %1653 = vadd.xlane.f32.xlu1 %v1652_v38 }
 0x43f   : > { %v2390_v27 = vpop.eup %2389  ;;  %2401 = vpow2.f32 %v1615_v29 }
 0x440   : > { %v2392_v32 = vpop.eup %2391  ;;  %2403 = vpow2.f32 %v1617_v33 }
 0x441   : > { %v2394_v34 = vpop.eup %2393  ;;  %v1655_v44 = vadd.f32 %v2392_v32, %v2390_v27 }
 0x442   : > { %v2396_v37 = vpop.eup %2395 }
 0x443   : > { %1656 = vadd.xlane.f32.xlu0 %v1655_v44  ;;  %v1658_v41 = vadd.f32 %v2396_v37, %v2394_v34 }
 0x445   : > { %1659 = vadd.xlane.f32.xlu1 %v1658_v41 }
 0x447   : > { %v2398_v3 = vpop.eup %2397 }
 0x448   : > { %v2400_v4 = vpop.eup %2399 }
 0x449   : > { %v2402_v45 = vpop.eup %2401  ;;  %v1661_v13 = vadd.f32 %v2400_v4, %v2398_v3 }
 0x44a   : > { %v2404_v51 = vpop.eup %2403 }
 0x44b   : > { %1662 = vadd.xlane.f32.xlu0 %v1661_v13  ;;  %v1664_v16 = vadd.f32 %v2404_v51, %v2402_v45 }
 0x44d   : > { %1665 = vadd.xlane.f32.xlu1 %v1664_v16 }
 0x4a0   : > { %v1621_v46 = vpop.xlane.xlu0 %1620 }
 0x4a1   : > { %2405 = vlog2.f32 %v1621_v46 }
 0x4a3   : > { %v1624_v48 = vpop.xlane.xlu1 %1623 }
 0x4a4   : > { %2407 = vlog2.f32 %v1624_v48 }
 0x4a8   : > { %v1627_v31 = vpop.xlane.xlu0 %1626 }
 0x4a9   : > { %2409 = vlog2.f32 %v1627_v31 }
 0x4ab   : > { %v2406_v35 = vpop.eup %2405  ;;  %v1630_v62 = vpop.xlane.xlu1 %1629 }
 0x4ac   : > { %v1668_v24 = vmul.f32 0.6931472, %v2406_v35  ;;  %2411 = vlog2.f32 %v1630_v62 }
 0x4ae   : > { %v2408_v12 = vpop.eup %2407  ;;  %v1699_v17 = vsub.f32 %v3041_v47, %v1668_v24  ;;  %v1700_v59 = vsub.f32 %v3044_v49, %v1668_v24 }
 0x4af   : > { %v1670_v26 = vmul.f32 0.6931472, %v2408_v12 }
 0x4b0   : > { %1731 = vst [vmem:[%s3173_s17] sm:$0xff] %v1699_v17  ;;  %1732 = vst [vmem:[%s3173_s17 + $0x8] sm:$0xff] %v1700_v59  ;;  %v1633_v5 = vpop.xlane.xlu0 %1632 }
 0x4b1   : > { %v1701_v10 = vsub.f32 %v3049_v53, %v1670_v26  ;;  %v1702_v56 = vsub.f32 %v3052_v54, %v1670_v26  ;;  %2413 = vlog2.f32 %v1633_v5 }
 0x4b3   : > { %v2410_v47 = vpop.eup %2409  ;;  %1733 = vst [vmem:[%s3173_s17 + $0x10] sm:$0xff] %v1701_v10  ;;  %1734 = vst [vmem:[%s3173_s17 + $0x18] sm:$0xff] %v1702_v56  ;;  %v1636_v49 = vpop.xlane.xlu1 %1635 }
 0x4b4   : > { %v1672_v58 = vmul.f32 0.6931472, %v2410_v47  ;;  %2415 = vlog2.f32 %v1636_v49 }
 0x4b6   : > { %v2412_v11 = vpop.eup %2411  ;;  %v1703_v15 = vsub.f32 %v3057_v57, %v1672_v58  ;;  %v1704_v18 = vsub.f32 %v3060_v60, %v1672_v58 }
 0x4b7   : > { %v1674_v38 = vmul.f32 0.6931472, %v2412_v11 }
 0x4b8   : > { %1735 = vst [vmem:[%s3173_s17 + $0x20] sm:$0xff] %v1703_v15  ;;  %1736 = vst [vmem:[%s3173_s17 + $0x28] sm:$0xff] %v1704_v18  ;;  %v1639_v53 = vpop.xlane.xlu0 %1638 }
 0x4b9   : > { %v1705_v54 = vsub.f32 %v3065_v0, %v1674_v38  ;;  %v1706_v29 = vsub.f32 %v3068_v1, %v1674_v38  ;;  %2417 = vlog2.f32 %v1639_v53 }
 0x4bb   : > { %v2414_v33 = vpop.eup %2413  ;;  %1737 = vst [vmem:[%s3173_s17 + $0x30] sm:$0xff] %v1705_v54  ;;  %1738 = vst [vmem:[%s3173_s17 + $0x38] sm:$0xff] %v1706_v29  ;;  %v1642_v27 = vpop.xlane.xlu1 %1641 }
 0x4bc   : > { %v1676_v57 = vmul.f32 0.6931472, %v2414_v33  ;;  %2419 = vlog2.f32 %v1642_v27 }
 0x4be   : > { %v2416_v60 = vpop.eup %2415  ;;  %v1707_v32 = vsub.f32 %v3073_v9, %v1676_v57  ;;  %v1708_v34 = vsub.f32 %v3076_v28, %v1676_v57 }
 0x4bf   : > { %v1678_v44 = vmul.f32 0.6931472, %v2416_v60 }
 0x4c0   : > { %1739 = vst [vmem:[%s3173_s17 + $0x40] sm:$0xff] %v1707_v32  ;;  %1740 = vst [vmem:[%s3173_s17 + $0x48] sm:$0xff] %v1708_v34  ;;  %v1645_v0 = vpop.xlane.xlu0 %1644 }
 0x4c1   : > { %v1709_v1 = vsub.f32 %v3081_v21, %v1678_v44  ;;  %v1710_v37 = vsub.f32 %v3084_v23, %v1678_v44  ;;  %2421 = vlog2.f32 %v1645_v0 }
 0x4c3   : > { %v2418_v41 = vpop.eup %2417  ;;  %1741 = vst [vmem:[%s3173_s17 + $0x50] sm:$0xff] %v1709_v1  ;;  %1742 = vst [vmem:[%s3173_s17 + $0x58] sm:$0xff] %v1710_v37  ;;  %v1648_v3 = vpop.xlane.xlu1 %1647 }
 0x4c4   : > { %v1680_v9 = vmul.f32 0.6931472, %v2418_v41  ;;  %2423 = vlog2.f32 %v1648_v3 }
 0x4c6   : > { %v2420_v28 = vpop.eup %2419  ;;  %v1711_v4 = vsub.f32 %v3089_v40, %v1680_v9  ;;  %v1712_v45 = vsub.f32 %v3092_v42, %v1680_v9 }
 0x4c7   : > { %v1682_v13 = vmul.f32 0.6931472, %v2420_v28 }
 0x4c8   : > { %1743 = vst [vmem:[%s3173_s17 + $0x60] sm:$0xff] %v1711_v4  ;;  %1744 = vst [vmem:[%s3173_s17 + $0x68] sm:$0xff] %v1712_v45  ;;  %v1651_v21 = vpop.xlane.xlu0 %1650 }
 0x4c9   : > { %v1713_v23 = vsub.f32 %v3097_v14, %v1682_v13  ;;  %v1714_v51 = vsub.f32 %v3100_v55, %v1682_v13  ;;  %2425 = vlog2.f32 %v1651_v21 }
 0x4cb   : > { %v2422_v16 = vpop.eup %2421  ;;  %1745 = vst [vmem:[%s3173_s17 + $0x70] sm:$0xff] %v1713_v23  ;;  %1746 = vst [vmem:[%s3173_s17 + $0x78] sm:$0xff] %v1714_v51  ;;  %v1654_v46 = vpop.xlane.xlu1 %1653 }
 0x4cc   : > { %v1684_v40 = vmul.f32 0.6931472, %v2422_v16  ;;  %2427 = vlog2.f32 %v1654_v46 }
 0x4ce   : > { %v2424_v42 = vpop.eup %2423  ;;  %v1715_v48 = vsub.f32 %v3105_v50, %v1684_v40  ;;  %v1716_v31 = vsub.f32 %v3108_v52, %v1684_v40 }
 0x4cf   : > { %v1686_v35 = vmul.f32 0.6931472, %v2424_v42 }
 0x4d0   : > { %1747 = vst [vmem:[%s3173_s17 + $0x80] sm:$0xff] %v1715_v48  ;;  %1748 = vst [vmem:[%s3173_s17 + $0x88] sm:$0xff] %v1716_v31  ;;  %v1657_v14 = vpop.xlane.xlu0 %1656 }
 0x4d1   : > { %v1717_v55 = vsub.f32 %v3113_v7, %v1686_v35  ;;  %v1718_v62 = vsub.f32 %v3116_v30, %v1686_v35  ;;  %2429 = vlog2.f32 %v1657_v14 }
 0x4d2   : > { %v1660_v24 = vpop.xlane.xlu1 %1659 }
 0x4d3   : > { %v2426_v12 = vpop.eup %2425  ;;  %1749 = vst [vmem:[%s3173_s17 + $0x90] sm:$0xff] %v1717_v55  ;;  %1750 = vst [vmem:[%s3173_s17 + $0x98] sm:$0xff] %v1718_v62  ;;  %2431 = vlog2.f32 %v1660_v24 }
 0x4d4   : > { %v1688_v50 = vmul.f32 0.6931472, %v2426_v12 }
 0x4d6   : > { %v2428_v52 = vpop.eup %2427  ;;  %v1719_v17 = vsub.f32 %v3121_v61, %v1688_v50  ;;  %v1720_v59 = vsub.f32 %v3124_v63, %v1688_v50 }
 0x4d7   : > { %v1690_v26 = vmul.f32 0.6931472, %v2428_v52 }
 0x4d8   : > { %1751 = vst [vmem:[%s3173_s17 + $0xa0] sm:$0xff] %v1719_v17  ;;  %1752 = vst [vmem:[%s3173_s17 + $0xa8] sm:$0xff] %v1720_v59  ;;  %v1663_v7 = vpop.xlane.xlu0 %1662 }
 0x4d9   : > { %v1721_v30 = vsub.f32 %v3129_v39, %v1690_v26  ;;  %v1722_v5 = vsub.f32 %v3132_v43, %v1690_v26  ;;  %2433 = vlog2.f32 %v1663_v7 }
 0x4da   : > { %v1666_v10 = vpop.xlane.xlu1 %1665 }
 0x4db   : > { %v2430_v56 = vpop.eup %2429  ;;  %1753 = vst [vmem:[%s3173_s17 + $0xb0] sm:$0xff] %v1721_v30  ;;  %1754 = vst [vmem:[%s3173_s17 + $0xb8] sm:$0xff] %v1722_v5  ;;  %2435 = vlog2.f32 %v1666_v10 }
 0x4dc   : > { %v1692_v61 = vmul.f32 0.6931472, %v2430_v56 }
 0x4dd   : > { %v2432_v63 = vpop.eup %2431 }
 0x4de   : > { %v1723_v47 = vsub.f32 %v3137_v6, %v1692_v61  ;;  %v1724_v49 = vsub.f32 %v3140_v8, %v1692_v61  ;;  %v1694_v58 = vmul.f32 0.6931472, %v2432_v63 }
 0x4e0   : > { %1755 = vst [vmem:[%s3173_s17 + $0xc0] sm:$0xff] %v1723_v47  ;;  %1756 = vst [vmem:[%s3173_s17 + $0xc8] sm:$0xff] %v1724_v49  ;;  %v1725_v39 = vsub.f32 %v3145_v20, %v1694_v58  ;;  %v1726_v43 = vsub.f32 %v3148_v2, %v1694_v58 }
 0x4e2   : > { %1757 = vst [vmem:[%s3173_s17 + $0xd0] sm:$0xff] %v1725_v39  ;;  %1758 = vst [vmem:[%s3173_s17 + $0xd8] sm:$0xff] %v1726_v43 }
 0x4e3   : > { %v2434_v11 = vpop.eup %2433 }
 0x4e4   : > { %v1696_v15 = vmul.f32 0.6931472, %v2434_v11 }
 0x4e5   : > { %v2436_v6 = vpop.eup %2435 }
 0x4e6   : > { %v1727_v8 = vsub.f32 %v3153_v19, %v1696_v15  ;;  %v1728_v18 = vsub.f32 %v3156_v22, %v1696_v15  ;;  %v1698_v38 = vmul.f32 0.6931472, %v2436_v6 }
 0x4e8   : > { %1759 = vst [vmem:[%s3173_s17 + $0xe0] sm:$0xff] %v1727_v8  ;;  %1760 = vst [vmem:[%s3173_s17 + $0xe8] sm:$0xff] %v1728_v18  ;;  %v1729_v20 = vsub.f32 %v3161_v25, %v1698_v38  ;;  %v1730_v2 = vsub.f32 %v3164_v36, %v1698_v38 }
 0x4ea   : > { %1761 = vst [vmem:[%s3173_s17 + $0xf0] sm:$0xff] %v1729_v20  ;;  %1762 = vst [vmem:[%s3173_s17 + $0xf8] sm:$0xff] %v1730_v2 }
 0x4eb   : > { %2450 = shalt.err (!%p2447_p3)
}
 0x4ec   : > { %s2451_s13 = scalar_lea.hbm %s3236_s28, 4096  ;;  %s2455_s16 = scalar_lea.hbm %s3295_s6, 8192 }
 0x4ed   : > { %p2452_p4 = scmp.ne.s32.totalorder %s3236_s28, %s2451_s13  ;;  %p2456_p9 = scmp.lt.u32.totalorder %s3236_s28, %s3295_s6 }
 0x4ee   : > { %p2457_p10 = scmp.lt.u32.totalorder %s2455_s16, %s2451_s13  ;;  %p2459_p12 = scmp.lt.u32.totalorder %s2451_s13, %s3236_s28 }
 0x4ef   : > { %p2453_p7 = pnand %p2452_p4, %p2580_p5 }
 0x4f0   : > { %p2458_p11 = por %p2457_p10, %p2456_p9 }
 0x4f1   : > { %p2454_p8 = pneg %p2453_p7 }
 0x4f2   : > { %p2460_p13 = por %p2459_p12, %p2458_p11 }
 0x4f4   : > { %p2461_p0 = pnand %p2460_p13, %p2454_p8 }
 0x4f6   : > { %2464 = shalt.err (!%p2461_p0)
}
 0x4f7   : > { %s2505_s18 = smov 256   ;;  %s2506_s20 = smov 16  }
 0x4f8   : > { %2244 = dma.vmem_to_hbm [thread:$0]  (%p2580_p5), %s3238_s19, 4096, %s3236_s28, %s3248_s25, %s2505_s18, %s2505_s18, %s2506_s20  }
 0x4f9 PF: > { %p2250_p1 = scmp.ge.s32.totalorder %s2499_s24, 2  ;;  %s1793_s26 = sand.u32 1, %s2487_s21  }
 0x4fa   : > { %s1794_s9 = scalar_lea.sflag [#allocation3], %s1793_s26 }
 0x4fb   : > { %p2247_p2 = pnand %p2250_p1, %p2584_p6 }
 0x4fd   : > { %2482 = dma.done.wait (!%p2247_p2), %s1794_s9, 4096  }
 0x4fe   : > { %2484 = vsyncadd (!%p2247_p2), %s1794_s9, 4294963200  ;;  %p16_p3 = scmp.ge.s32.totalorder %s2567_s27, 4   ;;  %s3298_s21 = smov %s2491_s22 }
 0x4ff   : > { %s3299_s22 = smov %s2495_s23  ;;  %s3300_s23 = smov %s2578_s30 }
 0x500   : > { %s3301_s24 = smov %s2567_s27  ;;  %18 = sbr.rel (!%p16_p3) target bundleno = 3 (0x3), region = 80 }
 0x507   :  { %1799 = vsyncpa [#allocation3], 1 }
 0x508   :  { %1801 = vsyncpa [#allocation3 + $0x1], 1 }

</bundles_post_ra>
